<compile_context>
chip_gen: v7x
topology: tpu7x:2x2x1
jax: 0.10.0
libtpu: 0.0.40
codegen_flags: <defaults>
</compile_context>

<pallas_src>
import math

import jax
import jax.numpy as jnp
from jax.experimental import pallas as pl
from jax.experimental.pallas import tpu as pltpu

# ------------------------- configuration -------------------------
BATCH = 2
CHANNELS = 3
IMG = 32
PATCH = 16
HIDDEN = 128          # ViT-B/16 uses 768
HEADS = 4             # ViT-B/16 uses 12
HEAD_DIM = HIDDEN // HEADS
MLP_DIM = 512         # ViT-B/16 uses 3072
LAYERS = 2            # ViT-B/16 uses 12
NUM_CLASSES = 10
NUM_PATCHES = (IMG // PATCH) ** 2
SEQ = NUM_PATCHES + 1          # real tokens (CLS + patches) = 5
S_PAD = 8                      # padded to a sublane multiple
LN_EPS = 1e-6                  # torchvision ViT uses LayerNorm(eps=1e-6)
CPP = CHANNELS * PATCH * PATCH


# ------------------------- in-kernel helpers -------------------------
def _layernorm(x, g, b):
    """Row-wise LayerNorm over the last axis, biased variance like torch (f32 math)."""
    mean = jnp.mean(x, axis=-1, keepdims=True)
    cen = x - mean
    var = jnp.mean(cen * cen, axis=-1, keepdims=True)
    return cen * jax.lax.rsqrt(var + LN_EPS) * g + b


def _gelu(y):
    # TODO(synk): torchvision MLPBlock uses exact erf-GELU; tanh approximation is
    # used here (EUP-friendly, Mosaic-safe); max abs diff ~1e-3.
    c = math.sqrt(2.0 / math.pi)
    return 0.5 * y * (1.0 + jnp.tanh(c * (y + 0.044715 * y * y * y)))


# ------------------------- Pallas kernels -------------------------
def _patch_embed_kernel(p_ref, w_ref, b_ref, o_ref):
    """tokens = patches @ W + b  (conv_proj with stride==kernel as a matmul)."""
    p = p_ref[...].astype(jnp.bfloat16)
    y = jnp.dot(p, w_ref[...], preferred_element_type=jnp.float32) + b_ref[...]
    o_ref[...] = y.astype(o_ref.dtype)


def pallas_patch_embed(patches, w, b):
    m, k = patches.shape
    n = w.shape[1]
    return pl.pallas_call(
        _patch_embed_kernel,
        grid=(1,),
        in_specs=[
            pl.BlockSpec((m, k), lambda i: (0, 0)),
            pl.BlockSpec((k, n), lambda i: (0, 0)),
            pl.BlockSpec((1, n), lambda i: (0, 0)),
        ],
        out_specs=pl.BlockSpec((m, n), lambda i: (0, 0)),
        out_shape=jax.ShapeDtypeStruct((m, n), jnp.bfloat16),
        compiler_params=pltpu.CompilerParams(dimension_semantics=("arbitrary",)),
    )(patches, w, b)


def _encoder_layer_kernel(x_ref,
                          ln1_g_ref, ln1_b_ref,
                          qkv_w_ref, qkv_b_ref,
                          out_w_ref, out_b_ref,
                          ln2_g_ref, ln2_b_ref,
                          fc1_w_ref, fc1_b_ref,
                          fc2_w_ref, fc2_b_ref,
                          o_ref):
    """One full torchvision EncoderBlock for one batch element, entirely in VMEM."""
    x = x_ref[0].astype(jnp.float32)                       # (S_PAD, H)

    # ---- self-attention sub-block: x = x + MHA(LN1(x)) ----
    y = _layernorm(x, ln1_g_ref[...], ln1_b_ref[...])
    qkv = jnp.dot(y.astype(jnp.bfloat16), qkv_w_ref[...],
                  preferred_element_type=jnp.float32) + qkv_b_ref[...]   # (S_PAD, 3H)

    # mask out padded key positions (s >= SEQ) so padding never leaks into real rows
    key_valid = jax.lax.broadcasted_iota(jnp.int32, (S_PAD, S_PAD), 1) < SEQ
    scale = 1.0 / math.sqrt(HEAD_DIM)
    out_w = out_w_ref[...]                                  # (H, H) bf16

    attn_proj = jnp.zeros((S_PAD, HIDDEN), jnp.float32)
    for hh in range(HEADS):                                 # static unrolled loop
        lo = hh * HEAD_DIM
        qh = qkv[:, lo:lo + HEAD_DIM].astype(jnp.bfloat16)                  # (S, D)
        kh = qkv[:, HIDDEN + lo:HIDDEN + lo + HEAD_DIM].astype(jnp.bfloat16)
        vh = qkv[:, 2 * HIDDEN + lo:2 * HIDDEN + lo + HEAD_DIM].astype(jnp.bfloat16)

        s = jax.lax.dot_general(qh, kh, (((1,), (1,)), ((), ())),
                                preferred_element_type=jnp.float32) * scale  # (S, S)
        s = jnp.where(key_valid, s, jnp.float32(-1e30))
        s = s - jnp.max(s, axis=-1, keepdims=True)
        p = jnp.exp(s)
        p = p * pl.reciprocal(jnp.sum(p, axis=-1, keepdims=True), approx=True)

        oh = jnp.dot(p.astype(jnp.bfloat16), vh,
                     preferred_element_type=jnp.float32)                     # (S, D)
        # fuse this head's slice of the output projection (keeps stores lane-dense)
        attn_proj = attn_proj + jnp.dot(oh.astype(jnp.bfloat16),
                                        out_w[lo:lo + HEAD_DIM, :],
                                        preferred_element_type=jnp.float32)

    h1 = x + attn_proj + out_b_ref[...]                     # residual 1

    # ---- MLP sub-block: x = x + MLP(LN2(x)) ----
    y2 = _layernorm(h1, ln2_g_ref[...], ln2_b_ref[...])
    z = jnp.dot(y2.astype(jnp.bfloat16), fc1_w_ref[...],
                preferred_element_type=jnp.float32) + fc1_b_ref[...]
    z = _gelu(z)
    z2 = jnp.dot(z.astype(jnp.bfloat16), fc2_w_ref[...],
                 preferred_element_type=jnp.float32) + fc2_b_ref[...]

    o_ref[0] = (h1 + z2).astype(o_ref.dtype)


def pallas_encoder_layer(x, lyr):
    b = x.shape[0]

    def full(shape):
        return pl.BlockSpec(shape, lambda i: (0, 0))

    return pl.pallas_call(
        _encoder_layer_kernel,
        grid=(b,),
        in_specs=[
            pl.BlockSpec((1, S_PAD, HIDDEN), lambda i: (i, 0, 0)),
            full((1, HIDDEN)), full((1, HIDDEN)),
            full((HIDDEN, 3 * HIDDEN)), full((1, 3 * HIDDEN)),
            full((HIDDEN, HIDDEN)), full((1, HIDDEN)),
            full((1, HIDDEN)), full((1, HIDDEN)),
            full((HIDDEN, MLP_DIM)), full((1, MLP_DIM)),
            full((MLP_DIM, HIDDEN)), full((1, HIDDEN)),
        ],
        out_specs=pl.BlockSpec((1, S_PAD, HIDDEN), lambda i: (i, 0, 0)),
        out_shape=jax.ShapeDtypeStruct((b, S_PAD, HIDDEN), jnp.bfloat16),
        compiler_params=pltpu.CompilerParams(dimension_semantics=("parallel",)),
    )(x, lyr["ln1_g"], lyr["ln1_b"], lyr["qkv_w"], lyr["qkv_b"],
      lyr["out_w"], lyr["out_b"], lyr["ln2_g"], lyr["ln2_b"],
      lyr["fc1_w"], lyr["fc1_b"], lyr["fc2_w"], lyr["fc2_b"])


def _final_ln_kernel(x_ref, g_ref, b_ref, o_ref):
    x = x_ref[...].astype(jnp.float32)
    o_ref[...] = _layernorm(x, g_ref[...], b_ref[...]).astype(o_ref.dtype)


def pallas_final_layernorm(x, g, b):
    m, d = x.shape
    return pl.pallas_call(
        _final_ln_kernel,
        grid=(1,),
        in_specs=[
            pl.BlockSpec((m, d), lambda i: (0, 0)),
            pl.BlockSpec((1, d), lambda i: (0, 0)),
            pl.BlockSpec((1, d), lambda i: (0, 0)),
        ],
        out_specs=pl.BlockSpec((m, d), lambda i: (0, 0)),
        out_shape=jax.ShapeDtypeStruct((m, d), jnp.float32),
        compiler_params=pltpu.CompilerParams(dimension_semantics=("arbitrary",)),
    )(x, g, b)


# ------------------------- parameters (deterministic, synthetic) -------------------------
def init_params(key):
    keys = iter(jax.random.split(key, 64))

    def nrm(shape, std=0.02, dtype=jnp.bfloat16):
        return (std * jax.random.normal(next(keys), shape, dtype=jnp.float32)).astype(dtype)

    params = {
        "patch_w": nrm((CPP, HIDDEN)),                         # conv_proj as matmul (bf16)
        "patch_b": jnp.zeros((1, HIDDEN), jnp.float32),
        "cls": nrm((1, 1, HIDDEN)),                            # class_token (bf16)
        "pos": nrm((1, SEQ, HIDDEN)),                          # encoder.pos_embedding (bf16)
        "ln_f_g": jnp.ones((1, HIDDEN), jnp.float32),          # encoder.ln
        "ln_f_b": jnp.zeros((1, HIDDEN), jnp.float32),
        "head_w": nrm((HIDDEN, NUM_CLASSES), dtype=jnp.float32),   # nn.Linear head
        "head_b": jnp.zeros((NUM_CLASSES,), jnp.float32),
        "layers": [],
    }
    for _ in range(LAYERS):
        params["layers"].append({
            "ln1_g": jnp.ones((1, HIDDEN), jnp.float32),
            "ln1_b": jnp.zeros((1, HIDDEN), jnp.float32),
            "qkv_w": nrm((HIDDEN, 3 * HIDDEN)),                # in_proj_weight.T (bf16)
            "qkv_b": jnp.zeros((1, 3 * HIDDEN), jnp.float32),
            "out_w": nrm((HIDDEN, HIDDEN)),                    # out_proj.weight.T (bf16)
            "out_b": jnp.zeros((1, HIDDEN), jnp.float32),
            "ln2_g": jnp.ones((1, HIDDEN), jnp.float32),
            "ln2_b": jnp.zeros((1, HIDDEN), jnp.float32),
            "fc1_w": nrm((HIDDEN, MLP_DIM)),                   # bf16
            "fc1_b": jnp.zeros((1, MLP_DIM), jnp.float32),
            "fc2_w": nrm((MLP_DIM, HIDDEN)),                   # bf16
            "fc2_b": jnp.zeros((1, HIDDEN), jnp.float32),
        })
    return params


# ------------------------- forward pass -------------------------
def patchify(x):
    """NCHW image -> (B, num_patches, C*P*P), patch flattened in (C, P, P) order."""
    b, c, h, w = x.shape
    nh, nw = h // PATCH, w // PATCH
    x = x.reshape(b, c, nh, PATCH, nw, PATCH)
    x = x.transpose(0, 2, 4, 1, 3, 5)            # (B, nh, nw, C, P, P)
    return x.reshape(b, nh * nw, c * PATCH * PATCH)


def vit_forward(params, x):
    b = x.shape[0]

    # _process_input: conv_proj (stride==kernel conv) as a patch matmul -> (B, N, E)
    patches = patchify(x).reshape(b * NUM_PATCHES, CPP)
    tokens = pallas_patch_embed(patches, params["patch_w"], params["patch_b"])
    tokens = tokens.reshape(b, NUM_PATCHES, HIDDEN)

    # prepend class token, add positional embedding (dropout p=0 -> identity),
    # pad SEQ 5 -> 8 with zero rows (masked out as attention keys inside the kernel)
    cls = jnp.broadcast_to(params["cls"], (b, 1, HIDDEN))
    h = jnp.concatenate([cls, tokens], axis=1) + params["pos"]       # (B, SEQ, E) bf16
    h = jnp.pad(h, ((0, 0), (0, S_PAD - SEQ), (0, 0)))               # (B, S_PAD, E)

    # encoder: one fused Pallas kernel per layer, grid parallel over batch
    for lyr in params["layers"]:
        h = pallas_encoder_layer(h, lyr)

    # final encoder LayerNorm, take CLS token (x[:, 0])
    hf = pallas_final_layernorm(h.reshape(b * S_PAD, HIDDEN),
                                params["ln_f_g"], params["ln_f_b"])
    features = hf.reshape(b, S_PAD, HIDDEN)[:, 0]                    # (B, E) f32

    # classifier head in plain JAX (tiny matmul; a Pallas launch would cost more)
    logits = features @ params["head_w"] + params["head_b"]
    return logits


# ------------------------- main -------------------------
if __name__ == "__main__":
    key = jax.random.PRNGKey(0)
    pkey, xkey = jax.random.split(key)
    params = init_params(pkey)
    x = jax.random.normal(xkey, (BATCH, CHANNELS, IMG, IMG), dtype=jnp.float32)

    logits = jax.jit(vit_forward)(params, x)
    jax.block_until_ready(logits)
    assert logits.shape == (BATCH, NUM_CLASSES), logits.shape
    assert bool(jnp.all(jnp.isfinite(logits)))
    print("KERNEL_OK")
</pallas_src>

<mosaic_0001>
module attributes {stable_mosaic.version = 11 : i64} {
  func.func @_patch_embed_kernel(%arg0: i32, %arg1: memref<8x768xf32, #tpu.memory_space<vmem>>, %arg2: memref<768x128xbf16, #tpu.memory_space<vmem>>, %arg3: memref<1x128xf32, #tpu.memory_space<vmem>>, %arg4: memref<8x128xbf16, #tpu.memory_space<vmem>>) attributes {dimension_semantics = [#tpu.dimension_semantics<arbitrary>], iteration_bounds = array<i64: 1>, scalar_prefetch = 0 : i64, scratch_operands = 0 : i64, tpu.core_type = #tpu.core_type<tc>, window_params = [{pipeline_mode = #tpu.pipeline_mode<synchronous>, transform_indices = @transform_0, window_bounds = array<i64: 8, 768>}, {pipeline_mode = #tpu.pipeline_mode<synchronous>, transform_indices = @transform_1, window_bounds = array<i64: 768, 128>}, {pipeline_mode = #tpu.pipeline_mode<synchronous>, transform_indices = @transform_2, window_bounds = array<i64: 1, 128>}, {pipeline_mode = #tpu.pipeline_mode<synchronous>, transform_indices = @transform_3, window_bounds = array<i64: 8, 128>}]} {
    %c0 = arith.constant 0 : index
    %c0_0 = arith.constant 0 : index
    %0 = vector.load %arg1[%c0, %c0_0] : memref<8x768xf32, #tpu.memory_space<vmem>>, vector<8x768xf32>
    %1 = arith.truncf %0 : vector<8x768xf32> to vector<8x768xbf16>
    %c0_1 = arith.constant 0 : index
    %c0_2 = arith.constant 0 : index
    %2 = vector.load %arg2[%c0_1, %c0_2] : memref<768x128xbf16, #tpu.memory_space<vmem>>, vector<768x128xbf16>
    %cst = arith.constant dense<0.000000e+00> : vector<8x128xf32>
    %3 = tpu.matmul %1, %2, %cst {dimension_numbers = #tpu.dot_dimension_numbers<[1], [0], [0], [1], [0, 0, 1, 1], [], []>} : vector<8x768xbf16>, vector<768x128xbf16>, vector<8x128xf32> -> vector<8x128xf32>
    %c0_3 = arith.constant 0 : index
    %c0_4 = arith.constant 0 : index
    %4 = vector.load %arg3[%c0_3, %c0_4] : memref<1x128xf32, #tpu.memory_space<vmem>>, vector<1x128xf32>
    %5 = vector.broadcast %4 : vector<1x128xf32> to vector<8x128xf32>
    %6 = arith.addf %3, %5 : vector<8x128xf32>
    %7 = arith.truncf %6 : vector<8x128xf32> to vector<8x128xbf16>
    %c0_5 = arith.constant 0 : index
    %c0_6 = arith.constant 0 : index
    %8 = vector.load %arg4[%c0_5, %c0_6] : memref<8x128xbf16, #tpu.memory_space<vmem>>, vector<8x128xbf16>
    tpu.vector_store %arg4[%c0_5, %c0_6], %7 {strides = array<i32>} : memref<8x128xbf16, #tpu.memory_space<vmem>>, vector<8x128xbf16>,
    return
  }
  func.func @transform_0(%arg0: i32) -> (i32, i32) {
    %c0_i32 = arith.constant 0 : i32
    %c0_i32_0 = arith.constant 0 : i32
    %c0_i32_1 = arith.constant 0 : i32
    return %c0_i32, %c0_i32_0 : i32, i32
  }
  func.func @transform_1(%arg0: i32) -> (i32, i32) {
    %c0_i32 = arith.constant 0 : i32
    %c0_i32_0 = arith.constant 0 : i32
    %c0_i32_1 = arith.constant 0 : i32
    return %c0_i32, %c0_i32_0 : i32, i32
  }
  func.func @transform_2(%arg0: i32) -> (i32, i32) {
    %c0_i32 = arith.constant 0 : i32
    %c0_i32_0 = arith.constant 0 : i32
    %c0_i32_1 = arith.constant 0 : i32
    return %c0_i32, %c0_i32_0 : i32, i32
  }
  func.func @transform_3(%arg0: i32) -> (i32, i32) {
    %c0_i32 = arith.constant 0 : i32
    %c0_i32_0 = arith.constant 0 : i32
    %c0_i32_1 = arith.constant 0 : i32
    return %c0_i32, %c0_i32_0 : i32, i32
  }
}

module attributes {stable_mosaic.version = 11 : i64} {
  func.func @_final_ln_kernel(%arg0: i32, %arg1: memref<16x128xbf16, #tpu.memory_space<vmem>>, %arg2: memref<1x128xf32, #tpu.memory_space<vmem>>, %arg3: memref<1x128xf32, #tpu.memory_space<vmem>>, %arg4: memref<16x128xf32, #tpu.memory_space<vmem>>) attributes {dimension_semantics = [#tpu.dimension_semantics<arbitrary>], iteration_bounds = array<i64: 1>, scalar_prefetch = 0 : i64, scratch_operands = 0 : i64, tpu.core_type = #tpu.core_type<tc>, window_params = [{pipeline_mode = #tpu.pipeline_mode<synchronous>, transform_indices = @transform_0, window_bounds = array<i64: 16, 128>}, {pipeline_mode = #tpu.pipeline_mode<synchronous>, transform_indices = @transform_1, window_bounds = array<i64: 1, 128>}, {pipeline_mode = #tpu.pipeline_mode<synchronous>, transform_indices = @transform_2, window_bounds = array<i64: 1, 128>}, {pipeline_mode = #tpu.pipeline_mode<synchronous>, transform_indices = @transform_3, window_bounds = array<i64: 16, 128>}]} {
    %c0 = arith.constant 0 : index
    %c0_0 = arith.constant 0 : index
    %0 = vector.load %arg1[%c0, %c0_0] : memref<16x128xbf16, #tpu.memory_space<vmem>>, vector<16x128xbf16>
    %1 = arith.extf %0 : vector<16x128xbf16> to vector<16x128xf32>
    %c0_1 = arith.constant 0 : index
    %c0_2 = arith.constant 0 : index
    %2 = vector.load %arg2[%c0_1, %c0_2] : memref<1x128xf32, #tpu.memory_space<vmem>>, vector<1x128xf32>
    %c0_3 = arith.constant 0 : index
    %c0_4 = arith.constant 0 : index
    %3 = vector.load %arg3[%c0_3, %c0_4] : memref<1x128xf32, #tpu.memory_space<vmem>>, vector<1x128xf32>
    %cst = arith.constant dense<0.000000e+00> : vector<16xf32>
    %4 = vector.multi_reduction <add>, %1, %cst [1] : vector<16x128xf32> to vector<16xf32>
    %5 = vector.shape_cast %4 : vector<16xf32> to vector<16x1xf32>
    %cst_5 = arith.constant 1.280000e+02 : f32
    %6 = vector.broadcast %cst_5 : f32 to vector<16x1xf32>
    %7 = arith.divf %5, %6 : vector<16x1xf32>
    %8 = vector.broadcast %7 : vector<16x1xf32> to vector<16x128xf32>
    %9 = arith.subf %1, %8 : vector<16x128xf32>
    %10 = arith.mulf %9, %9 : vector<16x128xf32>
    %cst_6 = arith.constant dense<0.000000e+00> : vector<16xf32>
    %11 = vector.multi_reduction <add>, %10, %cst_6 [1] : vector<16x128xf32> to vector<16xf32>
    %12 = vector.shape_cast %11 : vector<16xf32> to vector<16x1xf32>
    %cst_7 = arith.constant 1.280000e+02 : f32
    %13 = vector.broadcast %cst_7 : f32 to vector<16x1xf32>
    %14 = arith.divf %12, %13 : vector<16x1xf32>
    %cst_8 = arith.constant 9.99999997E-7 : f32
    %15 = vector.broadcast %cst_8 : f32 to vector<16x1xf32>
    %16 = arith.addf %14, %15 : vector<16x1xf32>
    %17 = math.rsqrt %16 : vector<16x1xf32>
    %18 = vector.broadcast %17 : vector<16x1xf32> to vector<16x128xf32>
    %19 = arith.mulf %9, %18 : vector<16x128xf32>
    %20 = vector.broadcast %2 : vector<1x128xf32> to vector<16x128xf32>
    %21 = arith.mulf %19, %20 : vector<16x128xf32>
    %22 = vector.broadcast %3 : vector<1x128xf32> to vector<16x128xf32>
    %23 = arith.addf %21, %22 : vector<16x128xf32>
    %c0_9 = arith.constant 0 : index
    %c0_10 = arith.constant 0 : index
    %24 = vector.load %arg4[%c0_9, %c0_10] : memref<16x128xf32, #tpu.memory_space<vmem>>, vector<16x128xf32>
    tpu.vector_store %arg4[%c0_9, %c0_10], %23 {strides = array<i32>} : memref<16x128xf32, #tpu.memory_space<vmem>>, vector<16x128xf32>,
    return
  }
  func.func @transform_0(%arg0: i32) -> (i32, i32) {
    %c0_i32 = arith.constant 0 : i32
    %c0_i32_0 = arith.constant 0 : i32
    %c0_i32_1 = arith.constant 0 : i32
    return %c0_i32, %c0_i32_0 : i32, i32
  }
  func.func @transform_1(%arg0: i32) -> (i32, i32) {
    %c0_i32 = arith.constant 0 : i32
    %c0_i32_0 = arith.constant 0 : i32
    %c0_i32_1 = arith.constant 0 : i32
    return %c0_i32, %c0_i32_0 : i32, i32
  }
  func.func @transform_2(%arg0: i32) -> (i32, i32) {
    %c0_i32 = arith.constant 0 : i32
    %c0_i32_0 = arith.constant 0 : i32
    %c0_i32_1 = arith.constant 0 : i32
    return %c0_i32, %c0_i32_0 : i32, i32
  }
  func.func @transform_3(%arg0: i32) -> (i32, i32) {
    %c0_i32 = arith.constant 0 : i32
    %c0_i32_0 = arith.constant 0 : i32
    %c0_i32_1 = arith.constant 0 : i32
    return %c0_i32, %c0_i32_0 : i32, i32
  }
}

module attributes {stable_mosaic.version = 11 : i64} {
  func.func @_encoder_layer_kernel(%arg0: i32, %arg1: memref<1x8x128xbf16, #tpu.memory_space<vmem>>, %arg2: memref<1x128xf32, #tpu.memory_space<vmem>>, %arg3: memref<1x128xf32, #tpu.memory_space<vmem>>, %arg4: memref<128x384xbf16, #tpu.memory_space<vmem>>, %arg5: memref<1x384xf32, #tpu.memory_space<vmem>>, %arg6: memref<128x128xbf16, #tpu.memory_space<vmem>>, %arg7: memref<1x128xf32, #tpu.memory_space<vmem>>, %arg8: memref<1x128xf32, #tpu.memory_space<vmem>>, %arg9: memref<1x128xf32, #tpu.memory_space<vmem>>, %arg10: memref<128x512xbf16, #tpu.memory_space<vmem>>, %arg11: memref<1x512xf32, #tpu.memory_space<vmem>>, %arg12: memref<512x128xbf16, #tpu.memory_space<vmem>>, %arg13: memref<1x128xf32, #tpu.memory_space<vmem>>, %arg14: memref<1x8x128xbf16, #tpu.memory_space<vmem>>) attributes {dimension_semantics = [#tpu.dimension_semantics<parallel>], iteration_bounds = array<i64: 2>, scalar_prefetch = 0 : i64, scratch_operands = 0 : i64, tpu.core_type = #tpu.core_type<tc>, window_params = [{transform_indices = @transform_0, window_bounds = array<i64: 1, 8, 128>}, {pipeline_mode = #tpu.pipeline_mode<synchronous>, transform_indices = @transform_1, window_bounds = array<i64: 1, 128>}, {pipeline_mode = #tpu.pipeline_mode<synchronous>, transform_indices = @transform_2, window_bounds = array<i64: 1, 128>}, {pipeline_mode = #tpu.pipeline_mode<synchronous>, transform_indices = @transform_3, window_bounds = array<i64: 128, 384>}, {pipeline_mode = #tpu.pipeline_mode<synchronous>, transform_indices = @transform_4, window_bounds = array<i64: 1, 384>}, {pipeline_mode = #tpu.pipeline_mode<synchronous>, transform_indices = @transform_5, window_bounds = array<i64: 128, 128>}, {pipeline_mode = #tpu.pipeline_mode<synchronous>, transform_indices = @transform_6, window_bounds = array<i64: 1, 128>}, {pipeline_mode = #tpu.pipeline_mode<synchronous>, transform_indices = @transform_7, window_bounds = array<i64: 1, 128>}, {pipeline_mode = #tpu.pipeline_mode<synchronous>, transform_indices = @transform_8, window_bounds = array<i64: 1, 128>}, {pipeline_mode = #tpu.pipeline_mode<synchronous>, transform_indices = @transform_9, window_bounds = array<i64: 128, 512>}, {pipeline_mode = #tpu.pipeline_mode<synchronous>, transform_indices = @transform_10, window_bounds = array<i64: 1, 512>}, {pipeline_mode = #tpu.pipeline_mode<synchronous>, transform_indices = @transform_11, window_bounds = array<i64: 512, 128>}, {pipeline_mode = #tpu.pipeline_mode<synchronous>, transform_indices = @transform_12, window_bounds = array<i64: 1, 128>}, {transform_indices = @transform_13, window_bounds = array<i64: 1, 8, 128>}]} {
    %c0 = arith.constant 0 : index
    %c0_0 = arith.constant 0 : index
    %c0_1 = arith.constant 0 : index
    %0 = vector.load %arg1[%c0, %c0_0, %c0_1] : memref<1x8x128xbf16, #tpu.memory_space<vmem>>, vector<1x8x128xbf16>
    %1 = vector.shape_cast %0 : vector<1x8x128xbf16> to vector<8x128xbf16>
    %2 = arith.extf %1 : vector<8x128xbf16> to vector<8x128xf32>
    %c0_2 = arith.constant 0 : index
    %c0_3 = arith.constant 0 : index
    %3 = vector.load %arg2[%c0_2, %c0_3] : memref<1x128xf32, #tpu.memory_space<vmem>>, vector<1x128xf32>
    %c0_4 = arith.constant 0 : index
    %c0_5 = arith.constant 0 : index
    %4 = vector.load %arg3[%c0_4, %c0_5] : memref<1x128xf32, #tpu.memory_space<vmem>>, vector<1x128xf32>
    %cst = arith.constant dense<0.000000e+00> : vector<8xf32>
    %5 = vector.multi_reduction <add>, %2, %cst [1] : vector<8x128xf32> to vector<8xf32>
    %6 = vector.shape_cast %5 : vector<8xf32> to vector<8x1xf32>
    %cst_6 = arith.constant 1.280000e+02 : f32
    %7 = vector.broadcast %cst_6 : f32 to vector<8x1xf32>
    %8 = arith.divf %6, %7 : vector<8x1xf32>
    %9 = vector.broadcast %8 : vector<8x1xf32> to vector<8x128xf32>
    %10 = arith.subf %2, %9 : vector<8x128xf32>
    %11 = arith.mulf %10, %10 : vector<8x128xf32>
    %cst_7 = arith.constant dense<0.000000e+00> : vector<8xf32>
    %12 = vector.multi_reduction <add>, %11, %cst_7 [1] : vector<8x128xf32> to vector<8xf32>
    %13 = vector.shape_cast %12 : vector<8xf32> to vector<8x1xf32>
    %cst_8 = arith.constant 1.280000e+02 : f32
    %14 = vector.broadcast %cst_8 : f32 to vector<8x1xf32>
    %15 = arith.divf %13, %14 : vector<8x1xf32>
    %cst_9 = arith.constant 9.99999997E-7 : f32
    %16 = vector.broadcast %cst_9 : f32 to vector<8x1xf32>
    %17 = arith.addf %15, %16 : vector<8x1xf32>
    %18 = math.rsqrt %17 : vector<8x1xf32>
    %19 = vector.broadcast %18 : vector<8x1xf32> to vector<8x128xf32>
    %20 = arith.mulf %10, %19 : vector<8x128xf32>
    %21 = vector.broadcast %3 : vector<1x128xf32> to vector<8x128xf32>
    %22 = arith.mulf %20, %21 : vector<8x128xf32>
    %23 = vector.broadcast %4 : vector<1x128xf32> to vector<8x128xf32>
    %24 = arith.addf %22, %23 : vector<8x128xf32>
    %25 = arith.truncf %24 : vector<8x128xf32> to vector<8x128xbf16>
    %c0_10 = arith.constant 0 : index
    %c0_11 = arith.constant 0 : index
    %26 = vector.load %arg4[%c0_10, %c0_11] : memref<128x384xbf16, #tpu.memory_space<vmem>>, vector<128x384xbf16>
    %cst_12 = arith.constant dense<0.000000e+00> : vector<8x384xf32>
    %27 = tpu.matmul %25, %26, %cst_12 {dimension_numbers = #tpu.dot_dimension_numbers<[1], [0], [0], [1], [0, 0, 1, 1], [], []>} : vector<8x128xbf16>, vector<128x384xbf16>, vector<8x384xf32> -> vector<8x384xf32>
    %c0_13 = arith.constant 0 : index
    %c0_14 = arith.constant 0 : index
    %28 = vector.load %arg5[%c0_13, %c0_14] : memref<1x384xf32, #tpu.memory_space<vmem>>, vector<1x384xf32>
    %29 = vector.broadcast %28 : vector<1x384xf32> to vector<8x384xf32>
    %30 = arith.addf %27, %29 : vector<8x384xf32>
    %31 = tpu.iota {dimensions = array<i32: 1>} : vector<8x8xi32>
    %c5_i32 = arith.constant 5 : i32
    %32 = vector.broadcast %c5_i32 : i32 to vector<8x8xi32>
    %33 = arith.cmpi slt, %31, %32 : vector<8x8xi32>
    %c0_15 = arith.constant 0 : index
    %c0_16 = arith.constant 0 : index
    %34 = vector.load %arg6[%c0_15, %c0_16] : memref<128x128xbf16, #tpu.memory_space<vmem>>, vector<128x128xbf16>
    %cst_17 = arith.constant 0.000000e+00 : f32
    %35 = vector.broadcast %cst_17 : f32 to vector<8x128xf32>
    %36 = vector.extract_strided_slice %30 {offsets = [0, 0], sizes = [8, 32], strides = [1, 1]} : vector<8x384xf32> to vector<8x32xf32>
    %37 = arith.truncf %36 : vector<8x32xf32> to vector<8x32xbf16>
    %38 = vector.extract_strided_slice %30 {offsets = [0, 128], sizes = [8, 32], strides = [1, 1]} : vector<8x384xf32> to vector<8x32xf32>
    %39 = arith.truncf %38 : vector<8x32xf32> to vector<8x32xbf16>
    %40 = vector.extract_strided_slice %30 {offsets = [0, 256], sizes = [8, 32], strides = [1, 1]} : vector<8x384xf32> to vector<8x32xf32>
    %41 = arith.truncf %40 : vector<8x32xf32> to vector<8x32xbf16>
    %cst_18 = arith.constant dense<0.000000e+00> : vector<8x8xf32>
    %42 = tpu.matmul %37, %39, %cst_18 {dimension_numbers = #tpu.dot_dimension_numbers<[1], [1], [0], [0], [0, 0, 1, 0], [], []>} : vector<8x32xbf16>, vector<8x32xbf16>, vector<8x8xf32> -> vector<8x8xf32>
    %cst_19 = arith.constant 0.176776692 : f32
    %43 = vector.broadcast %cst_19 : f32 to vector<8x8xf32>
    %44 = arith.mulf %42, %43 : vector<8x8xf32>
    %cst_20 = arith.constant -1.000000e+30 : f32
    %45 = vector.broadcast %cst_20 : f32 to vector<8x8xf32>
    %46 = arith.select %33, %44, %45 : vector<8x8xi1>, vector<8x8xf32>
    %cst_21 = arith.constant dense<0xFF800000> : vector<8xf32>
    %47 = vector.multi_reduction <maximumf>, %46, %cst_21 [1] : vector<8x8xf32> to vector<8xf32>
    %48 = vector.shape_cast %47 : vector<8xf32> to vector<8x1xf32>
    %49 = vector.broadcast %48 : vector<8x1xf32> to vector<8x8xf32>
    %50 = arith.subf %46, %49 : vector<8x8xf32>
    %51 = math.exp %50 : vector<8x8xf32>
    %cst_22 = arith.constant dense<0.000000e+00> : vector<8xf32>
    %52 = vector.multi_reduction <add>, %51, %cst_22 [1] : vector<8x8xf32> to vector<8xf32>
    %53 = vector.shape_cast %52 : vector<8xf32> to vector<8x1xf32>
    %54 = tpu.reciprocal %53 {approx = true} : vector<8x1xf32> -> vector<8x1xf32>
    %55 = vector.broadcast %54 : vector<8x1xf32> to vector<8x8xf32>
    %56 = arith.mulf %51, %55 : vector<8x8xf32>
    %57 = arith.truncf %56 : vector<8x8xf32> to vector<8x8xbf16>
    %cst_23 = arith.constant dense<0.000000e+00> : vector<8x32xf32>
    %58 = tpu.matmul %57, %41, %cst_23 {dimension_numbers = #tpu.dot_dimension_numbers<[1], [0], [0], [1], [0, 0, 1, 1], [], []>} : vector<8x8xbf16>, vector<8x32xbf16>, vector<8x32xf32> -> vector<8x32xf32>
    %59 = arith.truncf %58 : vector<8x32xf32> to vector<8x32xbf16>
    %60 = vector.extract_strided_slice %34 {offsets = [0, 0], sizes = [32, 128], strides = [1, 1]} : vector<128x128xbf16> to vector<32x128xbf16>
    %cst_24 = arith.constant dense<0.000000e+00> : vector<8x128xf32>
    %61 = tpu.matmul %59, %60, %cst_24 {dimension_numbers = #tpu.dot_dimension_numbers<[1], [0], [0], [1], [0, 0, 1, 1], [], []>} : vector<8x32xbf16>, vector<32x128xbf16>, vector<8x128xf32> -> vector<8x128xf32>
    %62 = arith.addf %35, %61 : vector<8x128xf32>
    %63 = vector.extract_strided_slice %30 {offsets = [0, 32], sizes = [8, 32], strides = [1, 1]} : vector<8x384xf32> to vector<8x32xf32>
    %64 = arith.truncf %63 : vector<8x32xf32> to vector<8x32xbf16>
    %65 = vector.extract_strided_slice %30 {offsets = [0, 160], sizes = [8, 32], strides = [1, 1]} : vector<8x384xf32> to vector<8x32xf32>
    %66 = arith.truncf %65 : vector<8x32xf32> to vector<8x32xbf16>
    %67 = vector.extract_strided_slice %30 {offsets = [0, 288], sizes = [8, 32], strides = [1, 1]} : vector<8x384xf32> to vector<8x32xf32>
    %68 = arith.truncf %67 : vector<8x32xf32> to vector<8x32xbf16>
    %cst_25 = arith.constant dense<0.000000e+00> : vector<8x8xf32>
    %69 = tpu.matmul %64, %66, %cst_25 {dimension_numbers = #tpu.dot_dimension_numbers<[1], [1], [0], [0], [0, 0, 1, 0], [], []>} : vector<8x32xbf16>, vector<8x32xbf16>, vector<8x8xf32> -> vector<8x8xf32>
    %cst_26 = arith.constant 0.176776692 : f32
    %70 = vector.broadcast %cst_26 : f32 to vector<8x8xf32>
    %71 = arith.mulf %69, %70 : vector<8x8xf32>
    %cst_27 = arith.constant -1.000000e+30 : f32
    %72 = vector.broadcast %cst_27 : f32 to vector<8x8xf32>
    %73 = arith.select %33, %71, %72 : vector<8x8xi1>, vector<8x8xf32>
    %cst_28 = arith.constant dense<0xFF800000> : vector<8xf32>
    %74 = vector.multi_reduction <maximumf>, %73, %cst_28 [1] : vector<8x8xf32> to vector<8xf32>
    %75 = vector.shape_cast %74 : vector<8xf32> to vector<8x1xf32>
    %76 = vector.broadcast %75 : vector<8x1xf32> to vector<8x8xf32>
    %77 = arith.subf %73, %76 : vector<8x8xf32>
    %78 = math.exp %77 : vector<8x8xf32>
    %cst_29 = arith.constant dense<0.000000e+00> : vector<8xf32>
    %79 = vector.multi_reduction <add>, %78, %cst_29 [1] : vector<8x8xf32> to vector<8xf32>
    %80 = vector.shape_cast %79 : vector<8xf32> to vector<8x1xf32>
    %81 = tpu.reciprocal %80 {approx = true} : vector<8x1xf32> -> vector<8x1xf32>
    %82 = vector.broadcast %81 : vector<8x1xf32> to vector<8x8xf32>
    %83 = arith.mulf %78, %82 : vector<8x8xf32>
    %84 = arith.truncf %83 : vector<8x8xf32> to vector<8x8xbf16>
    %cst_30 = arith.constant dense<0.000000e+00> : vector<8x32xf32>
    %85 = tpu.matmul %84, %68, %cst_30 {dimension_numbers = #tpu.dot_dimension_numbers<[1], [0], [0], [1], [0, 0, 1, 1], [], []>} : vector<8x8xbf16>, vector<8x32xbf16>, vector<8x32xf32> -> vector<8x32xf32>
    %86 = arith.truncf %85 : vector<8x32xf32> to vector<8x32xbf16>
    %87 = vector.extract_strided_slice %34 {offsets = [32, 0], sizes = [32, 128], strides = [1, 1]} : vector<128x128xbf16> to vector<32x128xbf16>
    %cst_31 = arith.constant dense<0.000000e+00> : vector<8x128xf32>
    %88 = tpu.matmul %86, %87, %cst_31 {dimension_numbers = #tpu.dot_dimension_numbers<[1], [0], [0], [1], [0, 0, 1, 1], [], []>} : vector<8x32xbf16>, vector<32x128xbf16>, vector<8x128xf32> -> vector<8x128xf32>
    %89 = arith.addf %62, %88 : vector<8x128xf32>
    %90 = vector.extract_strided_slice %30 {offsets = [0, 64], sizes = [8, 32], strides = [1, 1]} : vector<8x384xf32> to vector<8x32xf32>
    %91 = arith.truncf %90 : vector<8x32xf32> to vector<8x32xbf16>
    %92 = vector.extract_strided_slice %30 {offsets = [0, 192], sizes = [8, 32], strides = [1, 1]} : vector<8x384xf32> to vector<8x32xf32>
    %93 = arith.truncf %92 : vector<8x32xf32> to vector<8x32xbf16>
    %94 = vector.extract_strided_slice %30 {offsets = [0, 320], sizes = [8, 32], strides = [1, 1]} : vector<8x384xf32> to vector<8x32xf32>
    %95 = arith.truncf %94 : vector<8x32xf32> to vector<8x32xbf16>
    %cst_32 = arith.constant dense<0.000000e+00> : vector<8x8xf32>
    %96 = tpu.matmul %91, %93, %cst_32 {dimension_numbers = #tpu.dot_dimension_numbers<[1], [1], [0], [0], [0, 0, 1, 0], [], []>} : vector<8x32xbf16>, vector<8x32xbf16>, vector<8x8xf32> -> vector<8x8xf32>
    %cst_33 = arith.constant 0.176776692 : f32
    %97 = vector.broadcast %cst_33 : f32 to vector<8x8xf32>
    %98 = arith.mulf %96, %97 : vector<8x8xf32>
    %cst_34 = arith.constant -1.000000e+30 : f32
    %99 = vector.broadcast %cst_34 : f32 to vector<8x8xf32>
    %100 = arith.select %33, %98, %99 : vector<8x8xi1>, vector<8x8xf32>
    %cst_35 = arith.constant dense<0xFF800000> : vector<8xf32>
    %101 = vector.multi_reduction <maximumf>, %100, %cst_35 [1] : vector<8x8xf32> to vector<8xf32>
    %102 = vector.shape_cast %101 : vector<8xf32> to vector<8x1xf32>
    %103 = vector.broadcast %102 : vector<8x1xf32> to vector<8x8xf32>
    %104 = arith.subf %100, %103 : vector<8x8xf32>
    %105 = math.exp %104 : vector<8x8xf32>
    %cst_36 = arith.constant dense<0.000000e+00> : vector<8xf32>
    %106 = vector.multi_reduction <add>, %105, %cst_36 [1] : vector<8x8xf32> to vector<8xf32>
    %107 = vector.shape_cast %106 : vector<8xf32> to vector<8x1xf32>
    %108 = tpu.reciprocal %107 {approx = true} : vector<8x1xf32> -> vector<8x1xf32>
    %109 = vector.broadcast %108 : vector<8x1xf32> to vector<8x8xf32>
    %110 = arith.mulf %105, %109 : vector<8x8xf32>
    %111 = arith.truncf %110 : vector<8x8xf32> to vector<8x8xbf16>
    %cst_37 = arith.constant dense<0.000000e+00> : vector<8x32xf32>
    %112 = tpu.matmul %111, %95, %cst_37 {dimension_numbers = #tpu.dot_dimension_numbers<[1], [0], [0], [1], [0, 0, 1, 1], [], []>} : vector<8x8xbf16>, vector<8x32xbf16>, vector<8x32xf32> -> vector<8x32xf32>
    %113 = arith.truncf %112 : vector<8x32xf32> to vector<8x32xbf16>
    %114 = vector.extract_strided_slice %34 {offsets = [64, 0], sizes = [32, 128], strides = [1, 1]} : vector<128x128xbf16> to vector<32x128xbf16>
    %cst_38 = arith.constant dense<0.000000e+00> : vector<8x128xf32>
    %115 = tpu.matmul %113, %114, %cst_38 {dimension_numbers = #tpu.dot_dimension_numbers<[1], [0], [0], [1], [0, 0, 1, 1], [], []>} : vector<8x32xbf16>, vector<32x128xbf16>, vector<8x128xf32> -> vector<8x128xf32>
    %116 = arith.addf %89, %115 : vector<8x128xf32>
    %117 = vector.extract_strided_slice %30 {offsets = [0, 96], sizes = [8, 32], strides = [1, 1]} : vector<8x384xf32> to vector<8x32xf32>
    %118 = arith.truncf %117 : vector<8x32xf32> to vector<8x32xbf16>
    %119 = vector.extract_strided_slice %30 {offsets = [0, 224], sizes = [8, 32], strides = [1, 1]} : vector<8x384xf32> to vector<8x32xf32>
    %120 = arith.truncf %119 : vector<8x32xf32> to vector<8x32xbf16>
    %121 = vector.extract_strided_slice %30 {offsets = [0, 352], sizes = [8, 32], strides = [1, 1]} : vector<8x384xf32> to vector<8x32xf32>
    %122 = arith.truncf %121 : vector<8x32xf32> to vector<8x32xbf16>
    %cst_39 = arith.constant dense<0.000000e+00> : vector<8x8xf32>
    %123 = tpu.matmul %118, %120, %cst_39 {dimension_numbers = #tpu.dot_dimension_numbers<[1], [1], [0], [0], [0, 0, 1, 0], [], []>} : vector<8x32xbf16>, vector<8x32xbf16>, vector<8x8xf32> -> vector<8x8xf32>
    %cst_40 = arith.constant 0.176776692 : f32
    %124 = vector.broadcast %cst_40 : f32 to vector<8x8xf32>
    %125 = arith.mulf %123, %124 : vector<8x8xf32>
    %cst_41 = arith.constant -1.000000e+30 : f32
    %126 = vector.broadcast %cst_41 : f32 to vector<8x8xf32>
    %127 = arith.select %33, %125, %126 : vector<8x8xi1>, vector<8x8xf32>
    %cst_42 = arith.constant dense<0xFF800000> : vector<8xf32>
    %128 = vector.multi_reduction <maximumf>, %127, %cst_42 [1] : vector<8x8xf32> to vector<8xf32>
    %129 = vector.shape_cast %128 : vector<8xf32> to vector<8x1xf32>
    %130 = vector.broadcast %129 : vector<8x1xf32> to vector<8x8xf32>
    %131 = arith.subf %127, %130 : vector<8x8xf32>
    %132 = math.exp %131 : vector<8x8xf32>
    %cst_43 = arith.constant dense<0.000000e+00> : vector<8xf32>
    %133 = vector.multi_reduction <add>, %132, %cst_43 [1] : vector<8x8xf32> to vector<8xf32>
    %134 = vector.shape_cast %133 : vector<8xf32> to vector<8x1xf32>
    %135 = tpu.reciprocal %134 {approx = true} : vector<8x1xf32> -> vector<8x1xf32>
    %136 = vector.broadcast %135 : vector<8x1xf32> to vector<8x8xf32>
    %137 = arith.mulf %132, %136 : vector<8x8xf32>
    %138 = arith.truncf %137 : vector<8x8xf32> to vector<8x8xbf16>
    %cst_44 = arith.constant dense<0.000000e+00> : vector<8x32xf32>
    %139 = tpu.matmul %138, %122, %cst_44 {dimension_numbers = #tpu.dot_dimension_numbers<[1], [0], [0], [1], [0, 0, 1, 1], [], []>} : vector<8x8xbf16>, vector<8x32xbf16>, vector<8x32xf32> -> vector<8x32xf32>
    %140 = arith.truncf %139 : vector<8x32xf32> to vector<8x32xbf16>
    %141 = vector.extract_strided_slice %34 {offsets = [96, 0], sizes = [32, 128], strides = [1, 1]} : vector<128x128xbf16> to vector<32x128xbf16>
    %cst_45 = arith.constant dense<0.000000e+00> : vector<8x128xf32>
    %142 = tpu.matmul %140, %141, %cst_45 {dimension_numbers = #tpu.dot_dimension_numbers<[1], [0], [0], [1], [0, 0, 1, 1], [], []>} : vector<8x32xbf16>, vector<32x128xbf16>, vector<8x128xf32> -> vector<8x128xf32>
    %143 = arith.addf %116, %142 : vector<8x128xf32>
    %144 = arith.addf %2, %143 : vector<8x128xf32>
    %c0_46 = arith.constant 0 : index
    %c0_47 = arith.constant 0 : index
    %145 = vector.load %arg7[%c0_46, %c0_47] : memref<1x128xf32, #tpu.memory_space<vmem>>, vector<1x128xf32>
    %146 = vector.broadcast %145 : vector<1x128xf32> to vector<8x128xf32>
    %147 = arith.addf %144, %146 : vector<8x128xf32>
    %c0_48 = arith.constant 0 : index
    %c0_49 = arith.constant 0 : index
    %148 = vector.load %arg8[%c0_48, %c0_49] : memref<1x128xf32, #tpu.memory_space<vmem>>, vector<1x128xf32>
    %c0_50 = arith.constant 0 : index
    %c0_51 = arith.constant 0 : index
    %149 = vector.load %arg9[%c0_50, %c0_51] : memref<1x128xf32, #tpu.memory_space<vmem>>, vector<1x128xf32>
    %cst_52 = arith.constant dense<0.000000e+00> : vector<8xf32>
    %150 = vector.multi_reduction <add>, %147, %cst_52 [1] : vector<8x128xf32> to vector<8xf32>
    %151 = vector.shape_cast %150 : vector<8xf32> to vector<8x1xf32>
    %cst_53 = arith.constant 1.280000e+02 : f32
    %152 = vector.broadcast %cst_53 : f32 to vector<8x1xf32>
    %153 = arith.divf %151, %152 : vector<8x1xf32>
    %154 = vector.broadcast %153 : vector<8x1xf32> to vector<8x128xf32>
    %155 = arith.subf %147, %154 : vector<8x128xf32>
    %156 = arith.mulf %155, %155 : vector<8x128xf32>
    %cst_54 = arith.constant dense<0.000000e+00> : vector<8xf32>
    %157 = vector.multi_reduction <add>, %156, %cst_54 [1] : vector<8x128xf32> to vector<8xf32>
    %158 = vector.shape_cast %157 : vector<8xf32> to vector<8x1xf32>
    %cst_55 = arith.constant 1.280000e+02 : f32
    %159 = vector.broadcast %cst_55 : f32 to vector<8x1xf32>
    %160 = arith.divf %158, %159 : vector<8x1xf32>
    %cst_56 = arith.constant 9.99999997E-7 : f32
    %161 = vector.broadcast %cst_56 : f32 to vector<8x1xf32>
    %162 = arith.addf %160, %161 : vector<8x1xf32>
    %163 = math.rsqrt %162 : vector<8x1xf32>
    %164 = vector.broadcast %163 : vector<8x1xf32> to vector<8x128xf32>
    %165 = arith.mulf %155, %164 : vector<8x128xf32>
    %166 = vector.broadcast %148 : vector<1x128xf32> to vector<8x128xf32>
    %167 = arith.mulf %165, %166 : vector<8x128xf32>
    %168 = vector.broadcast %149 : vector<1x128xf32> to vector<8x128xf32>
    %169 = arith.addf %167, %168 : vector<8x128xf32>
    %170 = arith.truncf %169 : vector<8x128xf32> to vector<8x128xbf16>
    %c0_57 = arith.constant 0 : index
    %c0_58 = arith.constant 0 : index
    %171 = vector.load %arg10[%c0_57, %c0_58] : memref<128x512xbf16, #tpu.memory_space<vmem>>, vector<128x512xbf16>
    %cst_59 = arith.constant dense<0.000000e+00> : vector<8x512xf32>
    %172 = tpu.matmul %170, %171, %cst_59 {dimension_numbers = #tpu.dot_dimension_numbers<[1], [0], [0], [1], [0, 0, 1, 1], [], []>} : vector<8x128xbf16>, vector<128x512xbf16>, vector<8x512xf32> -> vector<8x512xf32>
    %c0_60 = arith.constant 0 : index
    %c0_61 = arith.constant 0 : index
    %173 = vector.load %arg11[%c0_60, %c0_61] : memref<1x512xf32, #tpu.memory_space<vmem>>, vector<1x512xf32>
    %174 = vector.broadcast %173 : vector<1x512xf32> to vector<8x512xf32>
    %175 = arith.addf %172, %174 : vector<8x512xf32>
    %cst_62 = arith.constant 5.000000e-01 : f32
    %176 = vector.broadcast %cst_62 : f32 to vector<8x512xf32>
    %177 = arith.mulf %176, %175 : vector<8x512xf32>
    %cst_63 = arith.constant 4.471500e-02 : f32
    %178 = vector.broadcast %cst_63 : f32 to vector<8x512xf32>
    %179 = arith.mulf %178, %175 : vector<8x512xf32>
    %180 = arith.mulf %179, %175 : vector<8x512xf32>
    %181 = arith.mulf %180, %175 : vector<8x512xf32>
    %182 = arith.addf %175, %181 : vector<8x512xf32>
    %cst_64 = arith.constant 0.797884583 : f32
    %183 = vector.broadcast %cst_64 : f32 to vector<8x512xf32>
    %184 = arith.mulf %183, %182 : vector<8x512xf32>
    %185 = math.tanh %184 : vector<8x512xf32>
    %cst_65 = arith.constant 1.000000e+00 : f32
    %186 = vector.broadcast %cst_65 : f32 to vector<8x512xf32>
    %187 = arith.addf %186, %185 : vector<8x512xf32>
    %188 = arith.mulf %177, %187 : vector<8x512xf32>
    %189 = arith.truncf %188 : vector<8x512xf32> to vector<8x512xbf16>
    %c0_66 = arith.constant 0 : index
    %c0_67 = arith.constant 0 : index
    %190 = vector.load %arg12[%c0_66, %c0_67] : memref<512x128xbf16, #tpu.memory_space<vmem>>, vector<512x128xbf16>
    %cst_68 = arith.constant dense<0.000000e+00> : vector<8x128xf32>
    %191 = tpu.matmul %189, %190, %cst_68 {dimension_numbers = #tpu.dot_dimension_numbers<[1], [0], [0], [1], [0, 0, 1, 1], [], []>} : vector<8x512xbf16>, vector<512x128xbf16>, vector<8x128xf32> -> vector<8x128xf32>
    %c0_69 = arith.constant 0 : index
    %c0_70 = arith.constant 0 : index
    %192 = vector.load %arg13[%c0_69, %c0_70] : memref<1x128xf32, #tpu.memory_space<vmem>>, vector<1x128xf32>
    %193 = vector.broadcast %192 : vector<1x128xf32> to vector<8x128xf32>
    %194 = arith.addf %191, %193 : vector<8x128xf32>
    %195 = arith.addf %147, %194 : vector<8x128xf32>
    %196 = arith.truncf %195 : vector<8x128xf32> to vector<8x128xbf16>
    %c0_71 = arith.constant 0 : index
    %c0_72 = arith.constant 0 : index
    %c0_73 = arith.constant 0 : index
    %197 = vector.load %arg14[%c0_71, %c0_72, %c0_73] : memref<1x8x128xbf16, #tpu.memory_space<vmem>>, vector<1x8x128xbf16>
    %198 = vector.shape_cast %197 : vector<1x8x128xbf16> to vector<8x128xbf16>
    %199 = vector.shape_cast %196 : vector<8x128xbf16> to vector<1x8x128xbf16>
    tpu.vector_store %arg14[%c0_71, %c0_72, %c0_73], %199 {strides = array<i32>} : memref<1x8x128xbf16, #tpu.memory_space<vmem>>, vector<1x8x128xbf16>,
    return
  }
  func.func @transform_0(%arg0: i32) -> (i32, i32, i32) {
    %c0_i32 = arith.constant 0 : i32
    %c0_i32_0 = arith.constant 0 : i32
    %c0_i32_1 = arith.constant 0 : i32
    return %arg0, %c0_i32, %c0_i32_0 : i32, i32, i32
  }
  func.func @transform_1(%arg0: i32) -> (i32, i32) {
    %c0_i32 = arith.constant 0 : i32
    %c0_i32_0 = arith.constant 0 : i32
    %c0_i32_1 = arith.constant 0 : i32
    return %c0_i32, %c0_i32_0 : i32, i32
  }
  func.func @transform_2(%arg0: i32) -> (i32, i32) {
    %c0_i32 = arith.constant 0 : i32
    %c0_i32_0 = arith.constant 0 : i32
    %c0_i32_1 = arith.constant 0 : i32
    return %c0_i32, %c0_i32_0 : i32, i32
  }
  func.func @transform_3(%arg0: i32) -> (i32, i32) {
    %c0_i32 = arith.constant 0 : i32
    %c0_i32_0 = arith.constant 0 : i32
    %c0_i32_1 = arith.constant 0 : i32
    return %c0_i32, %c0_i32_0 : i32, i32
  }
  func.func @transform_4(%arg0: i32) -> (i32, i32) {
    %c0_i32 = arith.constant 0 : i32
    %c0_i32_0 = arith.constant 0 : i32
    %c0_i32_1 = arith.constant 0 : i32
    return %c0_i32, %c0_i32_0 : i32, i32
  }
  func.func @transform_5(%arg0: i32) -> (i32, i32) {
    %c0_i32 = arith.constant 0 : i32
    %c0_i32_0 = arith.constant 0 : i32
    %c0_i32_1 = arith.constant 0 : i32
    return %c0_i32, %c0_i32_0 : i32, i32
  }
  func.func @transform_6(%arg0: i32) -> (i32, i32) {
    %c0_i32 = arith.constant 0 : i32
    %c0_i32_0 = arith.constant 0 : i32
    %c0_i32_1 = arith.constant 0 : i32
    return %c0_i32, %c0_i32_0 : i32, i32
  }
  func.func @transform_7(%arg0: i32) -> (i32, i32) {
    %c0_i32 = arith.constant 0 : i32
    %c0_i32_0 = arith.constant 0 : i32
    %c0_i32_1 = arith.constant 0 : i32
    return %c0_i32, %c0_i32_0 : i32, i32
  }
  func.func @transform_8(%arg0: i32) -> (i32, i32) {
    %c0_i32 = arith.constant 0 : i32
    %c0_i32_0 = arith.constant 0 : i32
    %c0_i32_1 = arith.constant 0 : i32
    return %c0_i32, %c0_i32_0 : i32, i32
  }
  func.func @transform_9(%arg0: i32) -> (i32, i32) {
    %c0_i32 = arith.constant 0 : i32
    %c0_i32_0 = arith.constant 0 : i32
    %c0_i32_1 = arith.constant 0 : i32
    return %c0_i32, %c0_i32_0 : i32, i32
  }
  func.func @transform_10(%arg0: i32) -> (i32, i32) {
    %c0_i32 = arith.constant 0 : i32
    %c0_i32_0 = arith.constant 0 : i32
    %c0_i32_1 = arith.constant 0 : i32
    return %c0_i32, %c0_i32_0 : i32, i32
  }
  func.func @transform_11(%arg0: i32) -> (i32, i32) {
    %c0_i32 = arith.constant 0 : i32
    %c0_i32_0 = arith.constant 0 : i32
    %c0_i32_1 = arith.constant 0 : i32
    return %c0_i32, %c0_i32_0 : i32, i32
  }
  func.func @transform_12(%arg0: i32) -> (i32, i32) {
    %c0_i32 = arith.constant 0 : i32
    %c0_i32_0 = arith.constant 0 : i32
    %c0_i32_1 = arith.constant 0 : i32
    return %c0_i32, %c0_i32_0 : i32, i32
  }
  func.func @transform_13(%arg0: i32) -> (i32, i32, i32) {
    %c0_i32 = arith.constant 0 : i32
    %c0_i32_0 = arith.constant 0 : i32
    %c0_i32_1 = arith.constant 0 : i32
    return %arg0, %c0_i32, %c0_i32_0 : i32, i32, i32
  }
}

</mosaic_0001>

<bundles_post_ra>
// kernel: vit_forward.4
= control target key start
LH: loop header
LB: loop body
LE: loop exit
PB: predicated region body
PF: predicated region fallthrough
CT: control target
= control target key end

     0   :  { %s895_s1 = inlined_call_operand.vmem [shape: bf16[768,128], index: 1, kind: input, shape index: {}]   ;;  %s896_s0 = inlined_call_operand.vmem [shape: f32[8,768], index: 0, kind: input, shape index: {}]   ;;  %s897_s2 = inlined_call_operand.vmem [shape: f32[1,128], index: 2, kind: input, shape index: {}]   ;;  %s898_s3 = inlined_call_operand.vmem [shape: bf16[8,128], index: 3, kind: output, shape index: {}]  }
   0x1   :  { %v659_v0 = vld [vmem:[%s895_s1 + $0x40] sm:$0xff]   ;;  %v663_v4 = vld [vmem:[%s895_s1 + $0x48] sm:$0xff]   ;;  %v667_v8 = vld [vmem:[%s895_s1 + $0x50] sm:$0xff]  }
   0x2   :  { %v660_v1 = vld [vmem:[%s895_s1] sm:$0xff]   ;;  %593 = vmatprep.subr.bf16.mxu0 %v659_v0  ;;  %v664_v5 = vld [vmem:[%s895_s1 + $0x8] sm:$0xff]   ;;  %v668_v9 = vld [vmem:[%s895_s1 + $0x10] sm:$0xff]  }
   0x3   :  { %v661_v2 = vld [vmem:[%s895_s1 + $0xc0] sm:$0xff]   ;;  %594 = vmatpush3.bf16.msra.mxu0 %v660_v1  ;;  %v665_v6 = vld [vmem:[%s895_s1 + $0xc8] sm:$0xff]   ;;  %v669_v10 = vld [vmem:[%s895_s1 + $0xd0] sm:$0xff]  }
   0x4   :  { %v662_v3 = vld [vmem:[%s895_s1 + $0x80] sm:$0xff]   ;;  %615 = vmatprep.subr.bf16.mxu1 %v661_v2  ;;  %595 = vmatprep.subr.bf16.mxu0 %v663_v4  ;;  %v666_v7 = vld [vmem:[%s895_s1 + $0x88] sm:$0xff]   ;;  %v670_v11 = vld [vmem:[%s895_s1 + $0x90] sm:$0xff]  }
   0x5   :  { %616 = vmatpush3.bf16.msra.mxu1 %v662_v3  ;;  %v671_v12 = vld [vmem:[%s895_s1 + $0x58] sm:$0xff]   ;;  %v675_v16 = vld [vmem:[%s895_s1 + $0x60] sm:$0xff]   ;;  %v679_v20 = vld [vmem:[%s895_s1 + $0x68] sm:$0xff]  }
   0x6   :  { %617 = vmatprep.subr.bf16.mxu1 %v665_v6  ;;  %v672_v13 = vld [vmem:[%s895_s1 + $0x18] sm:$0xff]   ;;  %v676_v17 = vld [vmem:[%s895_s1 + $0x20] sm:$0xff]   ;;  %v680_v21 = vld [vmem:[%s895_s1 + $0x28] sm:$0xff]  }
   0x7   :  { %596 = vmatpush3.bf16.msra.mxu0 %v664_v5  ;;  %v673_v14 = vld [vmem:[%s895_s1 + $0xd8] sm:$0xff]   ;;  %v677_v18 = vld [vmem:[%s895_s1 + $0xe0] sm:$0xff]   ;;  %v681_v22 = vld [vmem:[%s895_s1 + $0xe8] sm:$0xff]  }
   0x8   :  { %597 = vmatprep.subr.bf16.mxu0 %v667_v8  ;;  %v674_v15 = vld [vmem:[%s895_s1 + $0x98] sm:$0xff]   ;;  %v678_v19 = vld [vmem:[%s895_s1 + $0xa0] sm:$0xff]   ;;  %v682_v23 = vld [vmem:[%s895_s1 + $0xa8] sm:$0xff]  }
   0x9   :  { %618 = vmatpush3.bf16.msra.mxu1 %v666_v7  ;;  %v683_v24 = vld [vmem:[%s895_s1 + $0x70] sm:$0xff]   ;;  %v687_v28 = vld [vmem:[%s895_s1 + $0x78] sm:$0xff]   ;;  %v16_v31 = vld [vmem:[%s896_s0 + $0x8] sm:$0xff] }
   0xa   :  { %619 = vmatprep.subr.bf16.mxu1 %v669_v10  ;;  %v684_v25 = vld [vmem:[%s895_s1 + $0x30] sm:$0xff]   ;;  %v688_v29 = vld [vmem:[%s895_s1 + $0x38] sm:$0xff]   ;;  %v22_v32 = vpack.c.bf16 %v16_v31, %v16_v31  ;;  %v15_v34 = vld [vmem:[%s896_s0] sm:$0xff] }
   0xb   :  { %598 = vmatpush3.bf16.msra.mxu0 %v668_v9  ;;  %v685_v26 = vld [vmem:[%s895_s1 + $0xf0] sm:$0xff]   ;;  %v689_v30 = vld [vmem:[%s895_s1 + $0xf8] sm:$0xff]   ;;  %v21_v35 = vpack.c.bf16 %v15_v34, %v15_v34  ;;  %v691_v36 = vld [vmem:[%s895_s1 + $0x140] sm:$0xff]  }
   0xc   :  { %599 = vmatprep.subr.bf16.mxu0 %v671_v12  ;;  %v686_v27 = vld [vmem:[%s895_s1 + $0xb0] sm:$0xff]   ;;  %v690_v33 = vld [vmem:[%s895_s1 + $0xb8] sm:$0xff]   ;;  %450 = vmatprep.mubr.bf16.mxu0 %v22_v32  ;;  %v692_v39 = vld [vmem:[%s895_s1 + $0x100] sm:$0xff]  }
   0xd   :  { %620 = vmatpush3.bf16.msra.mxu1 %v670_v11  ;;  %v18_v37 = vld [vmem:[%s896_s0 + $0x18] sm:$0xff]  ;;  %v17_v40 = vld [vmem:[%s896_s0 + $0x10] sm:$0xff]  ;;  %v693_v42 = vld [vmem:[%s895_s1 + $0x148] sm:$0xff]  }
   0xe   :  { %621 = vmatprep.subr.bf16.mxu1 %v673_v14  ;;  %v24_v38 = vpack.c.bf16 %v18_v37, %v18_v37  ;;  %v23_v41 = vpack.c.bf16 %v17_v40, %v17_v40  ;;  %v694_v43 = vld [vmem:[%s895_s1 + $0x108] sm:$0xff]   ;;  %v695_v44 = vld [vmem:[%s895_s1 + $0x150] sm:$0xff]   ;;  %v697_v46 = vld [vmem:[%s895_s1 + $0x158] sm:$0xff]  }
   0xf   :  { %600 = vmatpush3.bf16.msra.mxu0 %v672_v13  ;;  %v696_v45 = vld [vmem:[%s895_s1 + $0x110] sm:$0xff]   ;;  %v698_v47 = vld [vmem:[%s895_s1 + $0x118] sm:$0xff]   ;;  %v699_v48 = vld [vmem:[%s895_s1 + $0x160] sm:$0xff]  }
  0x10   :  { %601 = vmatprep.subr.bf16.mxu0 %v675_v16  ;;  %490 = vmatprep.mubr.bf16.mxu1 %v24_v38  ;;  %v700_v49 = vld [vmem:[%s895_s1 + $0x120] sm:$0xff]   ;;  %v701_v50 = vld [vmem:[%s895_s1 + $0x168] sm:$0xff]   ;;  %v703_v54 = vld [vmem:[%s895_s1 + $0x170] sm:$0xff]  }
  0x11   :  { %622 = vmatpush3.bf16.msra.mxu1 %v674_v15  ;;  %v20_v51 = vld [vmem:[%s896_s0 + $0x28] sm:$0xff]  ;;  %v704_v55 = vld [vmem:[%s895_s1 + $0x130] sm:$0xff]   ;;  %v705_v56 = vld [vmem:[%s895_s1 + $0x178] sm:$0xff]  }
  0x12   :  { %623 = vmatprep.subr.bf16.mxu1 %v677_v18  ;;  %v26_v52 = vpack.c.bf16 %v20_v51, %v20_v51  ;;  %v702_v53 = vld [vmem:[%s895_s1 + $0x128] sm:$0xff]   ;;  %v706_v57 = vld [vmem:[%s895_s1 + $0x138] sm:$0xff]   ;;  %v19_v58 = vld [vmem:[%s896_s0 + $0x20] sm:$0xff] }
  0x13   :  { %602 = vmatpush3.bf16.msra.mxu0 %v676_v17  ;;  %v25_v59 = vpack.c.bf16 %v19_v58, %v19_v58  ;;  %v544_v61 = vld [vmem:[%s897_s2] ss:$0 sm:$0xff] }
  0x14   :  { %603 = vmatprep.subr.bf16.mxu0 %v679_v20 }
  0x15   :  { %624 = vmatpush3.bf16.msra.mxu1 %v678_v19 }
  0x16   :  { %625 = vmatprep.subr.bf16.mxu1 %v681_v22 }
  0x17   :  { %604 = vmatpush3.bf16.msra.mxu0 %v680_v21 }
  0x18   :  { %605 = vmatprep.subr.bf16.mxu0 %v683_v24 }
  0x19   :  { %626 = vmatpush3.bf16.msra.mxu1 %v682_v23 }
  0x1a   :  { %627 = vmatprep.subr.bf16.mxu1 %v685_v26 }
  0x1b   :  { %606 = vmatpush3.bf16.msra.mxu0 %v684_v25 }
  0x1c   :  { %607 = vmatprep.subr.bf16.mxu0 %v687_v28 }
  0x1d   :  { %628 = vmatpush3.bf16.msra.mxu1 %v686_v27 }
  0x1e   :  { %629 = vmatprep.subr.bf16.mxu1 %v689_v30 }
  0x1f   :  { %608 = vmatpush3.bf16.msra.mxu0 %v688_v29 }
  0x20   :  { %637 = vmatprep.subr.bf16.mxu0 %v691_v36 }
  0x21   :  { %630 = vmatpush3.bf16.msra.mxu1 %v690_v33 }
  0x22   :  { %451 = vmatmul.mubr.bf16.vlgmr.msra.gmra.mrb[0].mxu0 %v21_v35 }
  0x23   :  { %638 = vmatpush3.bf16.msra.mxu0 %v692_v39  ;;  %530 = vmatprep.mubr.bf16.mxu0 %v26_v52 }
  0x24   :  { %491 = vmatmul.mubr.bf16.vlgmr.msra.gmra.mrb[0].mxu1 %v23_v41  ;;  %639 = vmatprep.subr.bf16.mxu0 %v693_v42 }
  0x27   :  { %640 = vmatpush3.bf16.msra.mxu0 %v694_v43 }
  0x28   :  { %641 = vmatprep.subr.bf16.mxu0 %v695_v44 }
  0x2b   :  { %642 = vmatpush3.bf16.msra.mxu0 %v696_v45 }
  0x2c   :  { %643 = vmatprep.subr.bf16.mxu0 %v697_v46 }
  0x2f   :  { %644 = vmatpush3.bf16.msra.mxu0 %v698_v47 }
  0x30   :  { %645 = vmatprep.subr.bf16.mxu0 %v699_v48 }
  0x33   :  { %646 = vmatpush3.bf16.msra.mxu0 %v700_v49 }
  0x34   :  { %647 = vmatprep.subr.bf16.mxu0 %v701_v50 }
  0x37   :  { %648 = vmatpush3.bf16.msra.mxu0 %v702_v53 }
  0x38   :  { %649 = vmatprep.subr.bf16.mxu0 %v703_v54 }
  0x3b   :  { %650 = vmatpush3.bf16.msra.mxu0 %v704_v55 }
  0x3c   :  { %651 = vmatprep.subr.bf16.mxu0 %v705_v56 }
  0x3f   :  { %652 = vmatpush3.bf16.msra.mxu0 %v706_v57 }
  0x42   :  { %531 = vmatmul.mubr.bf16.vlgmr.msra.gmra.mrb[4].mxu0 %v25_v59 }
  0xf5   :  { %v609_v60 = vpop.f32.mrb[0].mxu0 }
  0xf6   :  { %v610_v62 = vpop.f32.mrb[1].mxu0 }
  0xf7   :  { %v611_v63 = vadd.f32 %v610_v62, %v609_v60  ;;  %v612_v0 = vpop.f32.mrb[2].mxu0  ;;  %v631_v1 = vpop.f32.mrb[0].mxu1 }
  0xf8   :  { %v613_v2 = vpop.f32.mrb[3].mxu0  ;;  %v632_v4 = vpop.f32.mrb[1].mxu1 }
  0xf9   :  { %v453_v3 = vadd.f32 %v611_v63, %v544_v61  ;;  %v633_v5 = vadd.f32 %v632_v4, %v631_v1  ;;  %v634_v6 = vpop.f32.mrb[2].mxu1 }
  0xfa   :  { %v635_v7 = vpop.f32.mrb[3].mxu1 }
  0xfb   :  { %v493_v8 = vadd.f32 %v633_v5, %v453_v3 }
 0x115   :  { %v653_v9 = vpop.f32.mrb[4].mxu0 }
 0x116   :  { %v654_v10 = vpop.f32.mrb[5].mxu0 }
 0x117   :  { %v655_v11 = vadd.f32 %v654_v10, %v653_v9  ;;  %v656_v12 = vpop.f32.mrb[6].mxu0 }
 0x118   :  { %v657_v13 = vpop.f32.mrb[7].mxu0 }
 0x119   :  { %v533_v14 = vadd.f32 %v655_v11, %v493_v8 }
 0x11b   :  { %v538_v15 = vpack.c.bf16 %v533_v14, %v533_v14 }
 0x11d   :  { %539 = vst [vmem:[%s898_s3] sm:$0xf] %v538_v15 }

// kernel: vit_forward.7
= control target key start
LH: loop header
LB: loop body
LE: loop exit
PB: predicated region body
PF: predicated region fallthrough
CT: control target
= control target key end

     0   :  { %s110_s0 = inlined_call_operand.vmem [shape: bf16[16,128], index: 0, kind: input, shape index: {}]   ;;  %s111_s1 = inlined_call_operand.vmem [shape: f32[1,128], index: 1, kind: input, shape index: {}]   ;;  %s112_s2 = inlined_call_operand.vmem [shape: f32[1,128], index: 2, kind: input, shape index: {}]   ;;  %s113_s3 = inlined_call_operand.vmem [shape: f32[16,128], index: 3, kind: output, shape index: {}]  }
   0x1   :  { %v68_v0 = vld [vmem:[%s110_s0] sm:$0xff]  }
   0x2   :  { %v69_v1 = vunpack.c.l.bf16 %v68_v0  ;;  %v70_v2 = vunpack.c.h.bf16 %v68_v0  ;;  %v65_v18 = vld [vmem:[%s111_s1] ss:$0 sm:$0xff] }
   0x3   :  { %v66_v20 = vld [vmem:[%s112_s2] ss:$0 sm:$0xff] }
   0x4   :  { %20 = vadd.xlane.f32.xlu0 %v69_v1 }
   0x8   :  { %22 = vadd.xlane.f32.xlu0 %v70_v2 }
  0x91   :  { %v21_v3 = vpop.xlane.xlu0 %20 }
  0x92   :  { %v25_v4 = vmul.f32 0.0078125, %v21_v3 }
  0x94   :  { %v27_v5 = vsub.f32 %v69_v1, %v25_v4 }
  0x95   :  { %v23_v6 = vpop.xlane.xlu0 %22 }
  0x96   :  { %v26_v7 = vmul.f32 0.0078125, %v23_v6  ;;  %v29_v8 = vmul.f32 %v27_v5, %v27_v5 }
  0x98   :  { %v28_v9 = vsub.f32 %v70_v2, %v26_v7  ;;  %31 = vadd.xlane.f32.xlu1 %v29_v8 }
  0x9a   :  { %v30_v10 = vmul.f32 %v28_v9, %v28_v9 }
  0x9c   :  { %33 = vadd.xlane.f32.xlu1 %v30_v10 }
 0x125   :  { %v32_v11 = vpop.xlane.xlu1 %31 }
 0x126   :  { %v35_v12 = vmul.f32 0.0078125, %v32_v11 }
 0x128   :  { %v37_v13 = vadd.f32 1e-06, %v35_v12 }
 0x129   :  { %v34_v14 = vpop.xlane.xlu1 %33 }
 0x12a   :  { %71 = vrsqrt.f32 %v37_v13  ;;  %v36_v15 = vmul.f32 0.0078125, %v34_v14 }
 0x12c   :  { %v38_v16 = vadd.f32 1e-06, %v36_v15 }
 0x12e   :  { %73 = vrsqrt.f32 %v38_v16 }
 0x134   :  { %v72_v17 = vpop.eup %71 }
 0x135   :  { %v41_v19 = vmul.f32 %v72_v17, %v27_v5 }
 0x137   :  { %v49_v21 = vmul.f32 %v65_v18, %v41_v19 }
 0x138   :  { %v74_v22 = vpop.eup %73 }
 0x139   :  { %v57_v23 = vadd.f32 %v66_v20, %v49_v21  ;;  %v42_v24 = vmul.f32 %v74_v22, %v28_v9 }
 0x13b   :  { %59 = vst [vmem:[%s113_s3] sm:$0xff] %v57_v23  ;;  %v50_v25 = vmul.f32 %v65_v18, %v42_v24 }
 0x13d   :  { %v58_v26 = vadd.f32 %v66_v20, %v50_v25 }
 0x13f   :  { %60 = vst [vmem:[%s113_s3 + $0x8] sm:$0xff] %v58_v26 }

// kernel: vit_forward.5
= control target key start
LH: loop header
LB: loop body
LE: loop exit
PB: predicated region body
PF: predicated region fallthrough
CT: control target
= control target key end

     0   :  { %s2744_s25 = smov 0   ;;  %s3230_s0 = inlined_call_operand.vmem [shape: bf16[2,8,128], index: 0, kind: input, shape index: {}]   ;;  %s3231_s1 = inlined_call_operand.vmem [shape: f32[1,128], index: 1, kind: input, shape index: {}]   ;;  %s3232_s2 = inlined_call_operand.vmem [shape: f32[1,128], index: 2, kind: input, shape index: {}]   ;;  %s3233_s3 = inlined_call_operand.vmem [shape: bf16[128,384], index: 3, kind: input, shape index: {}]   ;;  %s3234_s4 = inlined_call_operand.vmem [shape: f32[1,384], index: 4, kind: input, shape index: {}]   ;;  %s3235_s5 = inlined_call_operand.vmem [shape: bf16[128,128], index: 5, kind: input, shape index: {}]   ;;  %s3236_s6 = inlined_call_operand.vmem [shape: f32[1,128], index: 6, kind: input, shape index: {}]   ;;  %s3237_s7 = inlined_call_operand.vmem [shape: f32[1,128], index: 7, kind: input, shape index: {}]   ;;  %s3238_s8 = inlined_call_operand.vmem [shape: f32[1,128], index: 8, kind: input, shape index: {}]   ;;  %s3239_s9 = inlined_call_operand.vmem [shape: bf16[128,512], index: 9, kind: input, shape index: {}]   ;;  %s3240_s10 = inlined_call_operand.vmem [shape: f32[1,512], index: 10, kind: input, shape index: {}]   ;;  %s3241_s11 = inlined_call_operand.vmem [shape: bf16[512,128], index: 11, kind: input, shape index: {}]   ;;  %s3242_s12 = inlined_call_operand.vmem [shape: f32[1,128], index: 12, kind: input, shape index: {}]   ;;  %s3243_s13 = inlined_call_operand.vmem [shape: bf16[2,8,128], index: 13, kind: output, shape index: {}]  }
   0x1 LB: > { %s2194_s26 = sadd.s32 4294967295, %s2666_s25   ;;  %p2198_p0 = scmp.ge.s32.totalorder %s2666_s25, 1  ;;  %s2666_s25 = sphi %s2744_s25, %s23_s25  }
   0x2   : > { %p386_p1 = scmp.lt.s32.totalorder %s2666_s25, 3 }
   0x4   : > { %p387_p2 = pnand %p2198_p0, %p386_p1 }
   0x5   : > { %p428_p3 = scmp.lt.s32.totalorder (!%p387_p2), %s2194_s26, 1  ;;  %v2512_v2 = vld [vmem:[%s3233_s3 + $0x4] ss:$12 sps:$4 sm:$0xff] (!%p387_p2)   ;;  %v2514_v3 = vld [vmem:[%s3233_s3] ss:$12 sps:$4 sm:$0xff] (!%p387_p2)   ;;  %v2668_v4 = vmov (!%p387_p2), 0.0   ;;  %v502_v42 = vlaneseq (!%p387_p2) }
   0x6   : > { %390 = sbr.rel (%p387_p2) target bundleno = 3707 (0xe7b), region = 72  ;;  %2398 = vmatprep.subr.bf16.mxu1 (!%p387_p2), %v2668_v4  ;;  %v2515_v5 = vld [vmem:[%s3233_s3 + $0x8] ss:$12 sps:$4 sm:$0xff] (!%p387_p2)   ;;  %v2518_v7 = vld [vmem:[%s3233_s3 + $0x18] ss:$12 sps:$4 sm:$0xff] (!%p387_p2)   ;;  %645 = vmatprep.subr.bf16.mxu0 (!%p387_p2), %v2512_v2  ;;  %v2669_v26 = vmov (!%p387_p2), 0  }
   0x7   : > { %v2516_v6 = vld [vmem:[%s3233_s3 + $0x1c] ss:$12 sps:$4 sm:$0xff] (!%p387_p2)   ;;  %v2519_v8 = vld [vmem:[%s3233_s3 + $0x20] ss:$12 sps:$4 sm:$0xff] (!%p387_p2)   ;;  %646 = vmatpush1.bf16.msra.mxu0 (!%p387_p2), %v2514_v3  ;;  %2399 = vmatpush3.bf16.msra.mxu1 (!%p387_p2), %v2515_v5  ;;  %v2523_v15 = vld [vmem:[%s3233_s3 + $0x38] ss:$12 sps:$4 sm:$0xff] (!%p387_p2)  }
   0x8   : > { %v2520_v9 = vld [vmem:[%s3233_s3 + $0x34] ss:$12 sps:$4 sm:$0xff] (!%p387_p2)   ;;  %647 = vmatprep.subr.bf16.mxu0 (!%p387_p2), %v2516_v6  ;;  %2400 = vmatprep.subr.bf16.mxu1 (!%p387_p2), %v2668_v4  ;;  %v2522_v14 = vld [vmem:[%s3233_s3 + $0x30] ss:$12 sps:$4 sm:$0xff] (!%p387_p2)   ;;  %v2524_v16 = vld [vmem:[%s3233_s3 + $0x4c] ss:$12 sps:$4 sm:$0xff] (!%p387_p2)  }
   0x9   : > { %v2526_v17 = vld [vmem:[%s3233_s3 + $0x48] ss:$12 sps:$4 sm:$0xff] (!%p387_p2)   ;;  %v2527_v18 = vld [vmem:[%s3233_s3 + $0x50] ss:$12 sps:$4 sm:$0xff] (!%p387_p2)   ;;  %v2530_v20 = vld [vmem:[%s3233_s3 + $0x60] ss:$12 sps:$4 sm:$0xff] (!%p387_p2)   ;;  %677 = vmatprep.mubr.bf16.mxu0 (!%p387_p2), %v2669_v26 }
   0xa   : > { %v2528_v19 = vld [vmem:[%s3233_s3 + $0x64] ss:$12 sps:$4 sm:$0xff] (!%p387_p2)   ;;  %v2531_v21 = vld [vmem:[%s3233_s3 + $0x68] ss:$12 sps:$4 sm:$0xff] (!%p387_p2)   ;;  %v2535_v24 = vld [vmem:[%s3233_s3 + $0x80] ss:$12 sps:$4 sm:$0xff] (!%p387_p2)  }
   0xb   : > { %648 = vmatpush1.bf16.msra.mxu0 (!%p387_p2), %v2518_v7  ;;  %2401 = vmatpush3.bf16.msra.mxu1 (!%p387_p2), %v2519_v8  ;;  %v2532_v22 = vld [vmem:[%s3233_s3 + $0x7c] ss:$12 sps:$4 sm:$0xff] (!%p387_p2)   ;;  %v2534_v23 = vld [vmem:[%s3233_s3 + $0x78] ss:$12 sps:$4 sm:$0xff] (!%p387_p2)   ;;  %v2536_v25 = vld [vmem:[%s3233_s3 + $0x94] ss:$12 sps:$4 sm:$0xff] (!%p387_p2)  }
   0xc   : > { %649 = vmatprep.subr.bf16.mxu0 (!%p387_p2), %v2520_v9  ;;  %2402 = vmatprep.subr.bf16.mxu1 (!%p387_p2), %v2668_v4  ;;  %vm2670_vm0 = vmmov (!%p387_p2), 0   ;;  %v2538_v27 = vld [vmem:[%s3233_s3 + $0x90] ss:$12 sps:$4 sm:$0xff] (!%p387_p2)   ;;  %v2539_v28 = vld [vmem:[%s3233_s3 + $0x98] ss:$12 sps:$4 sm:$0xff] (!%p387_p2)   ;;  %v2859_v43 = vshrl.u32 (!%p387_p2), %v502_v42, 7 }
   0xd   : > { %s3245_s26 = smov (!%p428_p3, %s2194_s26), 1  ;;  %2414 = vmatprep.mubr.msk.bf16.mxu1 %vm2670_vm0, %v2668_v4  ;;  %v2540_v29 = vld [vmem:[%s3233_s3 + $0xac] ss:$12 sps:$4 sm:$0xff]   ;;  %v2542_v30 = vld [vmem:[%s3233_s3 + $0xa8] ss:$12 sps:$4 sm:$0xff]   ;;  %vm813_vm1 = vcmask 1043456  }
   0xe   : > { %s2199_s27 = sshll.u32 %s3245_s26, 2  ;;  %v2543_v31 = vld [vmem:[%s3233_s3 + $0xb0] ss:$12 sps:$4 sm:$0xff]   ;;  %v2201_v36 = vld [vmem:[%s3231_s1] ss:$0 sm:$0xff]  ;;  %v512_v44 = vsub.s32 2, %v2859_v43 }
   0xf   : > { %s431_s30 = scalar_lea.vmem %s3230_s0, %s2199_s27  ;;  %650 = vmatpush1.bf16.msra.mxu0 %v2522_v14  ;;  %2403 = vmatpush3.bf16.msra.mxu1 %v2523_v15  ;;  %v2202_v38 = vld [vmem:[%s3232_s2] ss:$0 sm:$0xff]  ;;  %v508_v46 = vsub.s32 1, %v2859_v43  ;;  %v504_v47 = vsub.s32 0, %v2859_v43  ;;  %vm748_vm2 = vcmask 261120   ;;  %s2671_s29 = smov 96  }
  0x10   : > { %v437_v0 = vld [vmem:[%s431_s30] sm:$0xf]  ;;  %2404 = vmatprep.subr.bf16.mxu1 %v2668_v4  ;;  %651 = vmatprep.subr.bf16.mxu0 %v2524_v16  ;;  %v2898_v8 = vand.u32 127, %v502_v42  ;;  %vm797_vm4 = vcmask 64512   ;;  %s2672_s30 = smov 64   ;;  %s2673_s22 = smov 32  }
  0x11   : > { %v2760_v1 = vunpack.c.l.bf16 %v437_v0  ;;  %v500_v45 = vld [vmem:[%s3234_s4] sm:$0x7]  ;;  %s435_s17 = scalar_lea.vmem %s3243_s13, %s2199_s27 }
  0x12   : > { %v513_v48 = vrot.slane %v500_v45, %v512_v44  ;;  %v509_v49 = vrot.slane %v500_v45, %v508_v46  ;;  %v505_v50 = vrot.slane %v500_v45, %v504_v47  ;;  %vm728_vm3 = vcmp.lt.s32.totalorder %v2898_v8, 5  ;;  %v2550_v8 = vld [vmem:[%s3235_s5 + $0x30] sm:$0xff]  }
  0x13   : > { %441 = vadd.xlane.f32.xlu0 %v2760_v1  ;;  %652 = vmatpush1.bf16.msra.mxu0 %v2526_v17 }
  0x14   : > { %2405 = vmatpush3.bf16.msra.mxu1 %v2527_v18  ;;  %653 = vmatprep.subr.bf16.mxu0 %v2528_v19 }
  0x15   : > { %2406 = vmatprep.subr.bf16.mxu1 %v2668_v4 }
  0x17   : > { %654 = vmatpush1.bf16.msra.mxu0 %v2530_v20 }
  0x18   : > { %2407 = vmatpush3.bf16.msra.mxu1 %v2531_v21  ;;  %655 = vmatprep.subr.bf16.mxu0 %v2532_v22 }
  0x19   : > { %2408 = vmatprep.subr.bf16.mxu1 %v2668_v4 }
  0x1b   : > { %656 = vmatpush1.bf16.msra.mxu0 %v2534_v23 }
  0x1c   : > { %2409 = vmatpush3.bf16.msra.mxu1 %v2535_v24  ;;  %657 = vmatprep.subr.bf16.mxu0 %v2536_v25 }
  0x1d   : > { %2410 = vmatprep.subr.bf16.mxu1 %v2668_v4 }
  0x1f   : > { %658 = vmatpush1.bf16.msra.mxu0 %v2538_v27 }
  0x20   : > { %2411 = vmatpush3.bf16.msra.mxu1 %v2539_v28  ;;  %659 = vmatprep.subr.bf16.mxu0 %v2540_v29 }
  0x21   : > { %2412 = vmatprep.subr.bf16.mxu1 %v2668_v4 }
  0x23   : > { %660 = vmatpush1.bf16.msra.mxu0 %v2542_v30 }
  0x24   : > { %2413 = vmatpush3.bf16.msra.mxu1 %v2543_v31  ;;  %2418 = vmatprep.subr.bf16.mxu0 %v2668_v4 }
  0x25   : > { %2424 = vmatprep.subr.bf16.mxu1 %v2668_v4 }
  0xa0   : > { %v442_v10 = vpop.xlane.xlu0 %441 }
  0xa1   : > { %v444_v11 = vmul.f32 0.0078125, %v442_v10 }
  0xa3   : > { %v445_v12 = vsub.f32 %v2760_v1, %v444_v11 }
  0xa5   : > { %v446_v13 = vmul.f32 %v445_v12, %v445_v12 }
  0xa7   : > { %447 = vadd.xlane.f32.xlu0 %v446_v13 }
 0x134   : > { %v448_v32 = vpop.xlane.xlu0 %447 }
 0x135   : > { %v449_v33 = vmul.f32 0.0078125, %v448_v32 }
 0x137   : > { %v450_v34 = vadd.f32 1e-06, %v449_v33 }
 0x139   : > { %2632 = vrsqrt.f32 %v450_v34 }
 0x143   : > { %v2633_v35 = vpop.eup %2632 }
 0x144   : > { %v452_v37 = vmul.f32 %v2633_v35, %v445_v12 }
 0x146   : > { %v459_v39 = vmul.f32 %v2201_v36, %v452_v37 }
 0x148   : > { %v466_v40 = vadd.f32 %v2202_v38, %v459_v39  ;;  %v2546_v38 = vld [vmem:[%s3235_s5 + $0x10] sm:$0xff]   ;;  %v2547_v39 = vld [vmem:[%s3235_s5 + $0x18] sm:$0xff]  }
 0x14a   : > { %v467_v41 = vpack.c.bf16 %v466_v40, %v466_v40 }
 0x14c   : > { %678 = vmatmul.mubr.bf16.vlgmr.msra.gmra.mrb[0].mxu0 %v467_v41  ;;  %2415 = vmatmul.mubr.bf16.vlgmr.msra.gmra.mrb[0].mxu1 %v467_v41 }
 0x14d   : > { %2420 = vmatprep.mubr.msk.bf16.mxu0 %vm2670_vm0, %v2668_v4  ;;  %2426 = vmatprep.mubr.msk.bf16.mxu1 %vm2670_vm0, %v2668_v4 }
 0x21f   : > { %v679_v51 = vpop.f32.mrb[0].mxu0  ;;  %v720_v52 = vpop.f32.mrb[0].mxu1 }
 0x220   : > { %v721_v53 = vadd.f32 %v720_v52, %v513_v48  ;;  %v681_v54 = vpop.f32.mrb[1].mxu0  ;;  %v2416_v55 = vpop.f32.mrb[1].mxu1  ;;  %v680_v62 = vadd.f32 %v679_v51, %v505_v50  ;;  %v2545_v51 = vld [vmem:[%s3235_s5 + $0x8] sm:$0xff]  }
 0x221   : > { %v682_v56 = vadd.f32 %v681_v54, %v509_v49  ;;  %v683_v57 = vpop.f32.mrb[2].mxu0  ;;  %v723_v58 = vpop.f32.mrb[2].mxu1  ;;  %v2544_v49 = vld [vmem:[%s3235_s5] sm:$0xff]  }
 0x222   : > { %v2873_v59 = vpack.c.bf16 %v721_v53, %v721_v53  ;;  %v684_v60 = vpop.f32.mrb[3].mxu0  ;;  %v2417_v61 = vpop.f32.mrb[3].mxu1  ;;  %v2884_v3 = vpack.c.bf16 %v680_v62, %v680_v62 }
 0x223   : > { %v2875_v63 = vpack.c.bf16 %v682_v56, %v682_v56 }
 0x224   : > { %v815_v0 = vsel %vm813_vm1, %v2873_v59, 0 }
 0x225   : > { %2425 = vmatpush3.bf16.msra.mxu1 %v815_v0  ;;  %862 = vrot.lane.b32.xlu1 %v2875_v63, %s2671_s29  ;;  %v753_v2 = vsel %vm748_vm2, %v2875_v63, 0 }
 0x226   : > { %2419 = vmatpush3.bf16.xpose.msra.mxu0 %v753_v2  ;;  %2436 = vmatprep.subr.bf16.mxu1 %v2668_v4 }
 0x227   : > { %2430 = vmatprep.subr.bf16.mxu0 %v2668_v4 }
 0x229   : > { %859 = vrot.lane.b32.xlu1 %v2884_v3, %s2671_s29 }
 0x22d   : > { %2421 = vmatmul.mubr.msk.bf16.vlgmr.msra.gmra.mrb[4].mxu0 %vm748_vm2, %v2884_v3 }
 0x22e   : > { %2432 = vmatprep.mubr.msk.bf16.mxu0 %vm2670_vm0, %v2668_v4 }
 0x297   : > { %v863_v5 = vpop.permute.xlu1 %862 }
 0x298   : > { %v868_v6 = vsel %vm748_vm2, %v863_v5, 0 }
 0x299   : > { %2431 = vmatpush3.bf16.xpose.msra.mxu0 %v868_v6 }
 0x29a   : > { %2442 = vmatprep.subr.bf16.mxu0 %v2668_v4 }
 0x29b   : > { %v860_v7 = vpop.permute.xlu1 %859 }
 0x2a0   : > { %2433 = vmatmul.mubr.msk.bf16.vlgmr.msra.gmra.mrb[8].mxu0 %vm748_vm2, %v860_v7 }
 0x2a1   : > { %2446 = vmatprep.mubr.msk.bf16.mxu0 %vm2670_vm0, %v2668_v4  ;;  %2443 = vmatpush3.bf16.msra.mxu0 %v2546_v38 }
 0x2a2   : > { %2444 = vmatprep.subr.bf16.mxu0 %v2668_v4 }
 0x2a5   : > { %2445 = vmatpush3.bf16.msra.mxu0 %v2547_v39 }
 0x2a6   : > { %2458 = vmatprep.subr.bf16.mxu0 %v2668_v4 }
 0x300   : > { %v789_v9 = vpop.f32.mrb[4].mxu0 }
 0x301   : > { %v795_v10 = vmul.f32 0.17677669, %v789_v9  ;;  %v2422_v11 = vpop.f32.mrb[5].mxu0 }
 0x302   : > { %v792_v12 = vpop.f32.mrb[6].mxu0 }
 0x303   : > { %v2423_v13 = vpop.f32.mrb[7].mxu0  ;;  %v796_v14 = vsel %vm728_vm3, %v795_v10, -1e+30 }
 0x304   : > { %v798_v15 = vsel %vm797_vm4, %v796_v14, -inf }
 0x305   : > { %799 = vmax.xlane.f32.xlu0 %v798_v15 }
 0x373   : > { %v904_v16 = vpop.f32.mrb[8].mxu0 }
 0x374   : > { %v910_v17 = vmul.f32 0.17677669, %v904_v16  ;;  %v2434_v18 = vpop.f32.mrb[9].mxu0 }
 0x375   : > { %v907_v19 = vpop.f32.mrb[10].mxu0 }
 0x376   : > { %v2435_v20 = vpop.f32.mrb[11].mxu0  ;;  %v911_v21 = vsel %vm728_vm3, %v910_v17, -1e+30 }
 0x377   : > { %v912_v22 = vsel %vm797_vm4, %v911_v21, -inf }
 0x378   : > { %913 = vmax.xlane.f32.xlu1 %v912_v22 }
 0x389   : > { %1084 = vrot.lane.b32.xlu1 %v2884_v3, %s2672_s30 }
 0x392   : > { %v800_v23 = vpop.xlane.xlu0 %799 }
 0x393   : > { %v801_v24 = vsub.f32 %v796_v14, %v800_v23 }
 0x395   : > { %v802_v25 = vmul.f32 1.442695, %v801_v24 }
 0x397   : > { %2634 = vpow2.f32 %v802_v25 }
 0x3a1   : > { %v2635_v27 = vpop.eup %2634 }
 0x3a2   : > { %v804_v28 = vsel %vm797_vm4, %v2635_v27, 0.0 }
 0x3a3   : > { %805 = vadd.xlane.f32.xlu0 %v804_v28 }
 0x405   : > { %v914_v29 = vpop.xlane.xlu1 %913 }
 0x406   : > { %v915_v30 = vsub.f32 %v911_v21, %v914_v29 }
 0x408   : > { %v916_v31 = vmul.f32 1.442695, %v915_v30 }
 0x409   : > { %v1085_v5 = vpop.permute.xlu1 %1084 }
 0x40a   : > { %2636 = vpow2.f32 %v916_v31 }
 0x414   : > { %v2637_v32 = vpop.eup %2636 }
 0x415   : > { %v918_v33 = vsel %vm797_vm4, %v2637_v32, 0.0 }
 0x416   : > { %919 = vadd.xlane.f32.xlu0 %v918_v33 }
 0x42c   : > { %925 = vrot.lane.b32.xlu0 %v2873_v59, %s2671_s29 }
 0x430   : > { %v806_v34 = vpop.xlane.xlu0 %805  ;;  %1086 = vrot.lane.b32.xlu0 %v2875_v63, %s2672_s30 }
 0x431   : > { %2638 = vrcp.f32 %v806_v34 }
 0x43b   : > { %v2639_v35 = vpop.eup %2638 }
 0x43c   : > { %v808_v36 = vmul.f32 %v2639_v35, %v2635_v27 }
 0x43e   : > { %v809_v37 = vpack.c.bf16 %v808_v36, %v808_v36 }
 0x440   : > { %2427 = vmatmul.mubr.msk.bf16.vlgmr.msra.gmra.mrb[4].mxu1 %vm797_vm4, %v809_v37  ;;  %v2549_v37 = vld [vmem:[%s3235_s5 + $0x28] sm:$0xff]  }
 0x441   : > { %2438 = vmatprep.mubr.msk.bf16.mxu1 %vm2670_vm0, %v2668_v4 }
 0x4a3   : > { %v920_v40 = vpop.xlane.xlu0 %919 }
 0x4a4   : > { %2640 = vrcp.f32 %v920_v40 }
 0x4a7   : > { %v926_v41 = vpop.permute.xlu0 %925 }
 0x4a8   : > { %v931_v42 = vsel %vm813_vm1, %v926_v41, 0 }
 0x4a9   : > { %2437 = vmatpush3.bf16.msra.mxu1 %v931_v42 }
 0x4aa   : > { %2450 = vmatprep.subr.bf16.mxu1 %v2668_v4 }
 0x4ab   : > { %v1087_v57 = vpop.permute.xlu0 %1086 }
 0x4ac   : > { %v1092_v0 = vsel %vm748_vm2, %v1087_v57, 0 }
 0x4ae   : > { %v2641_v45 = vpop.eup %2640 }
 0x4af   : > { %v922_v48 = vmul.f32 %v2641_v45, %v2637_v32 }
 0x4b1   : > { %v923_v50 = vpack.c.bf16 %v922_v48, %v922_v48 }
 0x4b3   : > { %2439 = vmatmul.mubr.msk.bf16.vlgmr.msra.gmra.mrb[8].mxu1 %vm797_vm4, %v923_v50 }
 0x4b4   : > { %2451 = vmatpush3.bf16.msra.mxu1 %v2544_v49  ;;  %2454 = vmatprep.mubr.msk.bf16.mxu1 %vm2670_vm0, %v2668_v4 }
 0x4b5   : > { %2452 = vmatprep.subr.bf16.mxu1 %v2668_v4 }
 0x4b8   : > { %2453 = vmatpush3.bf16.msra.mxu1 %v2545_v51 }
 0x4b9   : > { %2464 = vmatprep.subr.bf16.mxu1 %v2668_v4 }
 0x513   : > { %v851_v52 = vpop.f32.mrb[4].mxu1 }
 0x514   : > { %v857_v53 = vpack.c.bf16 %v851_v52, %v851_v52  ;;  %v2428_v54 = vpop.f32.mrb[5].mxu1 }
 0x515   : > { %v854_v55 = vpop.f32.mrb[6].mxu1 }
 0x516   : > { %v2429_v56 = vpop.f32.mrb[7].mxu1  ;;  %2455 = vmatmul.mubr.msk.bf16.vlgmr.msra.gmra.mrb[12].mxu1 %vm748_vm2, %v857_v53 }
 0x517   : > { %2466 = vmatprep.mubr.msk.bf16.mxu1 %vm2670_vm0, %v2668_v4 }
 0x586   : > { %v967_v58 = vpop.f32.mrb[8].mxu1 }
 0x587   : > { %v973_v60 = vpack.c.bf16 %v967_v58, %v967_v58  ;;  %v2440_v61 = vpop.f32.mrb[9].mxu1 }
 0x588   : > { %v970_v62 = vpop.f32.mrb[10].mxu1 }
 0x589   : > { %v2441_v2 = vpop.f32.mrb[11].mxu1  ;;  %2447 = vmatmul.mubr.msk.bf16.vlgmr.msra.gmra.mrb[12].mxu0 %vm748_vm2, %v973_v60 }
 0x58a   : > { %2459 = vmatpush3.bf16.xpose.msra.mxu0 %v1092_v0  ;;  %2460 = vmatprep.mubr.msk.bf16.mxu0 %vm2670_vm0, %v2668_v4 }
 0x58b   : > { %2470 = vmatprep.subr.bf16.mxu0 %v2668_v4 }
 0x591   : > { %2461 = vmatmul.mubr.msk.bf16.vlgmr.msra.gmra.mrb[16].mxu0 %vm748_vm2, %v1085_v5 }
 0x592   : > { %2474 = vmatprep.mubr.msk.bf16.mxu0 %vm2670_vm0, %v2668_v4 }
 0x5e9   : > { %v1078_v6 = vpop.f32.mrb[12].mxu1 }
 0x5ea   : > { %v2456_v7 = vpop.f32.mrb[13].mxu1 }
 0x5eb   : > { %v1081_v9 = vpop.f32.mrb[14].mxu1 }
 0x5ec   : > { %v2457_v10 = vpop.f32.mrb[15].mxu1 }
 0x65c   : > { %v1023_v11 = vpop.f32.mrb[12].mxu0 }
 0x65d   : > { %v2950_v12 = vadd.f32 %v1078_v6, %v1023_v11  ;;  %v2448_v13 = vpop.f32.mrb[13].mxu0  ;;  %v2551_v11 = vld [vmem:[%s3235_s5 + $0x38] sm:$0xff]  }
 0x65e   : > { %v1026_v14 = vpop.f32.mrb[14].mxu0 }
 0x65f   : > { %v2449_v15 = vpop.f32.mrb[15].mxu0 }
 0x664   : > { %v1128_v16 = vpop.f32.mrb[16].mxu0 }
 0x665   : > { %v1134_v17 = vmul.f32 0.17677669, %v1128_v16  ;;  %v2462_v18 = vpop.f32.mrb[17].mxu0 }
 0x666   : > { %v1131_v19 = vpop.f32.mrb[18].mxu0 }
 0x667   : > { %v2463_v20 = vpop.f32.mrb[19].mxu0  ;;  %v1135_v21 = vsel %vm728_vm3, %v1134_v17, -1e+30 }
 0x668   : > { %v1136_v22 = vsel %vm797_vm4, %v1135_v21, -inf  ;;  %v2247_v20 = vld [vmem:[%s3236_s6] ss:$0 sm:$0xff] }
 0x669   : > { %1137 = vmax.xlane.f32.xlu0 %v1136_v22 }
 0x67f   : > { %1148 = vrot.lane.b32.xlu0 %v2873_v59, %s2672_s30 }
 0x683   : > { %1253 = vrot.lane.b32.xlu0 %v2884_v3, %s2673_s22  ;;  %v2548_v3 = vld [vmem:[%s3235_s5 + $0x20] sm:$0xff]  }
 0x684   : > { %2471 = vmatpush3.bf16.msra.mxu0 %v2548_v3  ;;  %v2566_v3 = vld [vmem:[%s3239_s9 + $0x44] ss:$16 sps:$4 sm:$0xff]  }
 0x685   : > { %2472 = vmatprep.subr.bf16.mxu0 %v2668_v4 }
 0x688   : > { %2473 = vmatpush3.bf16.msra.mxu0 %v2549_v37  ;;  %v2572_v37 = vld [vmem:[%s3239_s9 + $0x64] ss:$16 sps:$4 sm:$0xff]  }
 0x689   : > { %2484 = vmatprep.subr.bf16.mxu0 %v2668_v4 }
 0x6f6   : > { %v1138_v23 = vpop.xlane.xlu0 %1137 }
 0x6f7   : > { %v1139_v24 = vsub.f32 %v1135_v21, %v1138_v23 }
 0x6f9   : > { %v1140_v25 = vmul.f32 1.442695, %v1139_v24  ;;  %v2552_v24 = vld [vmem:[%s3239_s9] ss:$16 sps:$4 sm:$0xff]  }
 0x6fa   : > { %v1149_v27 = vpop.permute.xlu0 %1148 }
 0x6fb   : > { %2642 = vpow2.f32 %v1140_v25  ;;  %v1154_v28 = vsel %vm813_vm1, %v1149_v27, 0  ;;  %v2555_v25 = vld [vmem:[%s3239_s9 + $0x8] ss:$16 sps:$4 sm:$0xff]   ;;  %v2560_v27 = vld [vmem:[%s3239_s9 + $0x24] ss:$16 sps:$4 sm:$0xff]  }
 0x6fc   : > { %2465 = vmatpush3.bf16.msra.mxu1 %v1154_v28  ;;  %v2563_v28 = vld [vmem:[%s3239_s9 + $0x2c] ss:$16 sps:$4 sm:$0xff]  }
 0x6fd   : > { %2478 = vmatprep.subr.bf16.mxu1 %v2668_v4 }
 0x705   : > { %v2643_v29 = vpop.eup %2642 }
 0x706   : > { %v1142_v30 = vsel %vm797_vm4, %v2643_v29, 0.0 }
 0x707   : > { %1143 = vadd.xlane.f32.xlu1 %v1142_v30  ;;  %v2561_v30 = vld [vmem:[%s3239_s9 + $0x28] ss:$16 sps:$4 sm:$0xff]  }
 0x718   : > { %1255 = vrot.lane.b32.xlu1 %v2875_v63, %s2673_s22  ;;  %v1254_v63 = vpop.permute.xlu0 %1253 }
 0x794   : > { %v1144_v31 = vpop.xlane.xlu1 %1143 }
 0x795   : > { %2644 = vrcp.f32 %v1144_v31  ;;  %v2569_v31 = vld [vmem:[%s3239_s9 + $0x4c] ss:$16 sps:$4 sm:$0xff]  }
 0x798   : > { %v1256_v34 = vpop.permute.xlu1 %1255 }
 0x799   : > { %v1261_v36 = vsel %vm748_vm2, %v1256_v34, 0 }
 0x79f   : > { %v2645_v32 = vpop.eup %2644 }
 0x7a0   : > { %v1146_v33 = vmul.f32 %v2645_v32, %v2643_v29  ;;  %v2558_v29 = vld [vmem:[%s3239_s9 + $0x20] ss:$16 sps:$4 sm:$0xff]  }
 0x7a1   : > { %v2564_v32 = vld [vmem:[%s3239_s9 + $0x40] ss:$16 sps:$4 sm:$0xff]  }
 0x7a2   : > { %v1147_v35 = vpack.c.bf16 %v1146_v33, %v1146_v33  ;;  %v2567_v33 = vld [vmem:[%s3239_s9 + $0x48] ss:$16 sps:$4 sm:$0xff]  }
 0x7a4   : > { %2467 = vmatmul.mubr.msk.bf16.vlgmr.msra.gmra.mrb[16].mxu1 %vm797_vm4, %v1147_v35 }
 0x7a5   : > { %2479 = vmatpush3.bf16.xpose.msra.mxu1 %v1261_v36  ;;  %2480 = vmatprep.mubr.msk.bf16.mxu1 %vm2670_vm0, %v2668_v4 }
 0x7a6   : > { %2490 = vmatprep.subr.bf16.mxu1 %v2668_v4 }
 0x7ac   : > { %2481 = vmatmul.mubr.msk.bf16.vlgmr.msra.gmra.mrb[20].mxu1 %vm748_vm2, %v1254_v63 }
 0x7ad   : > { %2494 = vmatprep.mubr.msk.bf16.mxu1 %vm2670_vm0, %v2668_v4  ;;  %2491 = vmatpush3.bf16.msra.mxu1 %v2550_v8 }
 0x7ae   : > { %2492 = vmatprep.subr.bf16.mxu1 %v2668_v4 }
 0x7b1   : > { %2493 = vmatpush3.bf16.msra.mxu1 %v2551_v11  ;;  %v2600_v11 = vld [vmem:[%s3241_s11 + $0x40] sm:$0xff]  }
 0x877   : > { %v1190_v38 = vpop.f32.mrb[16].mxu1 }
 0x878   : > { %v1196_v39 = vpack.c.bf16 %v1190_v38, %v1190_v38  ;;  %v2468_v40 = vpop.f32.mrb[17].mxu1  ;;  %v2575_v38 = vld [vmem:[%s3239_s9 + $0x6c] ss:$16 sps:$4 sm:$0xff]  }
 0x879   : > { %v1193_v41 = vpop.f32.mrb[18].mxu1  ;;  %v2573_v40 = vld [vmem:[%s3239_s9 + $0x68] ss:$16 sps:$4 sm:$0xff]  }
 0x87a   : > { %v2469_v42 = vpop.f32.mrb[19].mxu1  ;;  %2475 = vmatmul.mubr.msk.bf16.vlgmr.msra.gmra.mrb[20].mxu0 %vm748_vm2, %v1196_v39  ;;  %v2570_v39 = vld [vmem:[%s3239_s9 + $0x60] ss:$16 sps:$4 sm:$0xff]   ;;  %v2578_v41 = vld [vmem:[%s3239_s9 + $0x84] ss:$16 sps:$4 sm:$0xff]  }
 0x87b   : > { %2486 = vmatprep.mubr.msk.bf16.mxu0 %vm2670_vm0, %v2668_v4  ;;  %v2581_v42 = vld [vmem:[%s3239_s9 + $0x8c] ss:$16 sps:$4 sm:$0xff]  }
 0x87f   : > { %v1297_v45 = vpop.f32.mrb[20].mxu1 }
 0x880   : > { %v1303_v48 = vmul.f32 0.17677669, %v1297_v45  ;;  %v2482_v49 = vpop.f32.mrb[21].mxu1  ;;  %v2576_v45 = vld [vmem:[%s3239_s9 + $0x80] ss:$16 sps:$4 sm:$0xff]  }
 0x881   : > { %v1300_v50 = vpop.f32.mrb[22].mxu1  ;;  %v2584_v49 = vld [vmem:[%s3239_s9 + $0xa4] ss:$16 sps:$4 sm:$0xff]  }
 0x882   : > { %v2483_v51 = vpop.f32.mrb[23].mxu1  ;;  %v1304_v52 = vsel %vm728_vm3, %v1303_v48, -1e+30  ;;  %v2579_v48 = vld [vmem:[%s3239_s9 + $0x88] ss:$16 sps:$4 sm:$0xff]  }
 0x883   : > { %v1305_v53 = vsel %vm797_vm4, %v1304_v52, -inf  ;;  %v2587_v50 = vld [vmem:[%s3239_s9 + $0xac] ss:$16 sps:$4 sm:$0xff]   ;;  %v2582_v51 = vld [vmem:[%s3239_s9 + $0xa0] ss:$16 sps:$4 sm:$0xff]  }
 0x884   : > { %1306 = vmax.xlane.f32.xlu0 %v1305_v53  ;;  %v2590_v53 = vld [vmem:[%s3239_s9 + $0xc4] ss:$16 sps:$4 sm:$0xff]  }
 0x89a   : > { %1317 = vrot.lane.b32.xlu0 %v2873_v59, %s2673_s22 }
 0x911   : > { %v1307_v54 = vpop.xlane.xlu0 %1306 }
 0x912   : > { %v1308_v55 = vsub.f32 %v1304_v52, %v1307_v54  ;;  %v2585_v52 = vld [vmem:[%s3239_s9 + $0xa8] ss:$16 sps:$4 sm:$0xff]   ;;  %v2593_v54 = vld [vmem:[%s3239_s9 + $0xcc] ss:$16 sps:$4 sm:$0xff]  }
 0x914   : > { %v1309_v56 = vmul.f32 1.442695, %v1308_v55  ;;  %v2588_v55 = vld [vmem:[%s3239_s9 + $0xc0] ss:$16 sps:$4 sm:$0xff]  }
 0x915   : > { %v1318_v57 = vpop.permute.xlu0 %1317 }
 0x916   : > { %2646 = vpow2.f32 %v1309_v56  ;;  %v1323_v58 = vsel %vm813_vm1, %v1318_v57, 0  ;;  %v2591_v56 = vld [vmem:[%s3239_s9 + $0xc8] ss:$16 sps:$4 sm:$0xff]   ;;  %v2596_v57 = vld [vmem:[%s3239_s9 + $0xe4] ss:$16 sps:$4 sm:$0xff]  }
 0x917   : > { %2485 = vmatpush3.bf16.msra.mxu0 %v1323_v58  ;;  %v2599_v58 = vld [vmem:[%s3239_s9 + $0xec] ss:$16 sps:$4 sm:$0xff]  }
 0x920   : > { %v2647_v60 = vpop.eup %2646 }
 0x921   : > { %v1311_v61 = vsel %vm797_vm4, %v2647_v60, 0.0 }
 0x922   : > { %1312 = vadd.xlane.f32.xlu1 %v1311_v61  ;;  %v2597_v61 = vld [vmem:[%s3239_s9 + $0xe8] ss:$16 sps:$4 sm:$0xff]  }
 0x94d   : > { %v1246_v59 = vpop.f32.mrb[20].mxu0 }
 0x94e   : > { %v1252_v62 = vadd.f32 %v1246_v59, %v2950_v12  ;;  %v2476_v0 = vpop.f32.mrb[21].mxu0 }
 0x94f   : > { %v1249_v2 = vpop.f32.mrb[22].mxu0 }
 0x950   : > { %v2477_v5 = vpop.f32.mrb[23].mxu0  ;;  %v2248_v2 = vld [vmem:[%s3237_s7] ss:$0 sm:$0xff] }
 0x9af   : > { %v1313_v6 = vpop.xlane.xlu1 %1312 }
 0x9b0   : > { %2648 = vrcp.f32 %v1313_v6  ;;  %v2249_v6 = vld [vmem:[%s3238_s8] ss:$0 sm:$0xff] }
 0x9ba   : > { %v2649_v7 = vpop.eup %2648 }
 0x9bb   : > { %v1315_v9 = vmul.f32 %v2649_v7, %v2647_v60  ;;  %v2594_v60 = vld [vmem:[%s3239_s9 + $0xe0] ss:$16 sps:$4 sm:$0xff]  }
 0x9bd   : > { %v1316_v10 = vpack.c.bf16 %v1315_v9, %v1315_v9 }
 0x9bf   : > { %2487 = vmatmul.mubr.msk.bf16.vlgmr.msra.gmra.mrb[24].mxu0 %vm797_vm4, %v1316_v10 }
 0x9c0   : > { %1705 = vmatprep.mubr.bf16.mxu0 %v2669_v26 }
 0xa92   : > { %v1359_v4 = vpop.f32.mrb[24].mxu0 }
 0xa93   : > { %v1365_v13 = vpack.c.bf16 %v1359_v4, %v1359_v4  ;;  %v2488_v12 = vpop.f32.mrb[25].mxu0  ;;  %v2601_v4 = vld [vmem:[%s3241_s11 + $0xc0] sm:$0xff]  }
 0xa94   : > { %v1362_v14 = vpop.f32.mrb[26].mxu0  ;;  %v2603_v12 = vld [vmem:[%s3241_s11 + $0x80] sm:$0xff]  }
 0xa95   : > { %v2489_v15 = vpop.f32.mrb[27].mxu0  ;;  %2495 = vmatmul.mubr.msk.bf16.vlgmr.msra.gmra.mrb[24].mxu1 %vm748_vm2, %v1365_v13  ;;  %v2602_v13 = vld [vmem:[%s3241_s11] sm:$0xff]   ;;  %v2604_v14 = vld [vmem:[%s3241_s11 + $0x48] sm:$0xff]  }
 0xa96   : > { %1746 = vmatprep.mubr.bf16.mxu1 %v2669_v26  ;;  %v2554_v26 = vld [vmem:[%s3239_s9 + $0x4] ss:$16 sps:$4 sm:$0xff]   ;;  %v2605_v15 = vld [vmem:[%s3241_s11 + $0xc8] sm:$0xff]  }
 0xa97   : > { %1673 = vmatprep.subr.bf16.mxu0 %v2554_v26  ;;  %v2614_v26 = vld [vmem:[%s3241_s11 + $0x18] sm:$0xff]  }
 0xa98   : > { %1674 = vmatpush1.bf16.msra.mxu0 %v2552_v24  ;;  %v2613_v24 = vld [vmem:[%s3241_s11 + $0xd8] sm:$0xff]  }
 0xa99   : > { %1675 = vmatprep.subr.bf16.mxu0 %v2560_v27  ;;  %v2617_v27 = vld [vmem:[%s3241_s11 + $0xe0] sm:$0xff]  }
 0xa9c   : > { %1676 = vmatpush1.bf16.msra.mxu0 %v2558_v29  ;;  %v2619_v29 = vld [vmem:[%s3241_s11 + $0xa0] sm:$0xff]  }
 0xa9d   : > { %1677 = vmatprep.subr.bf16.mxu0 %v2566_v3  ;;  %v2621_v3 = vld [vmem:[%s3241_s11 + $0xe8] sm:$0xff]  }
 0xaa0   : > { %1678 = vmatpush1.bf16.msra.mxu0 %v2564_v32  ;;  %v2623_v32 = vld [vmem:[%s3241_s11 + $0xa8] sm:$0xff]  }
 0xaa1   : > { %1679 = vmatprep.subr.bf16.mxu0 %v2572_v37  ;;  %v2629_v37 = vld [vmem:[%s3241_s11 + $0xf8] sm:$0xff]  }
 0xaa4   : > { %1680 = vmatpush1.bf16.msra.mxu0 %v2570_v39  ;;  %v2631_v39 = vld [vmem:[%s3241_s11 + $0xb8] sm:$0xff]  }
 0xaa5   : > { %1681 = vmatprep.subr.bf16.mxu0 %v2578_v41  ;;  %v1507_v41 = vsub.s32 3, %v2859_v43 }
 0xaa8   : > { %1682 = vmatpush1.bf16.msra.mxu0 %v2576_v45 }
 0xaa9   : > { %1683 = vmatprep.subr.bf16.mxu0 %v2584_v49 }
 0xaac   : > { %1684 = vmatpush1.bf16.msra.mxu0 %v2582_v51 }
 0xaad   : > { %1685 = vmatprep.subr.bf16.mxu0 %v2590_v53 }
 0xab0   : > { %1686 = vmatpush1.bf16.msra.mxu0 %v2588_v55 }
 0xab1   : > { %1687 = vmatprep.subr.bf16.mxu0 %v2596_v57 }
 0xab4   : > { %1688 = vmatpush1.bf16.msra.mxu0 %v2594_v60 }
 0xab5   : > { %2354 = vmatprep.subr.bf16.mxu0 %v2600_v11 }
 0xb68   : > { %v1415_v16 = vpop.f32.mrb[24].mxu1 }
 0xb69   : > { %v1421_v17 = vadd.f32 %v1415_v16, %v1252_v62  ;;  %v2496_v18 = vpop.f32.mrb[25].mxu1  ;;  %v2606_v16 = vld [vmem:[%s3241_s11 + $0x8] sm:$0xff]  }
 0xb6a   : > { %v1418_v19 = vpop.f32.mrb[26].mxu1  ;;  %v2608_v18 = vld [vmem:[%s3241_s11 + $0x50] sm:$0xff]  }
 0xb6b   : > { %v1422_v21 = vadd.f32 %v1421_v17, %v2760_v1  ;;  %v2497_v22 = vpop.f32.mrb[27].mxu1  ;;  %v2557_v1 = vld [vmem:[%s3239_s9 + $0xc] ss:$16 sps:$4 sm:$0xff]   ;;  %v2609_v19 = vld [vmem:[%s3241_s11 + $0xd0] sm:$0xff]  }
 0xb6c   : > { %1714 = vmatprep.subr.bf16.mxu1 %v2557_v1  ;;  %v2607_v17 = vld [vmem:[%s3241_s11 + $0x88] sm:$0xff]   ;;  %v2612_v22 = vld [vmem:[%s3241_s11 + $0x58] sm:$0xff]   ;;  %v2616_v1 = vld [vmem:[%s3241_s11 + $0x60] sm:$0xff]  }
 0xb6d   : > { %v3006_v23 = vadd.f32 %v2247_v20, %v1422_v21  ;;  %1715 = vmatpush1.bf16.msra.mxu1 %v2555_v25  ;;  %v2610_v20 = vld [vmem:[%s3241_s11 + $0x10] sm:$0xff]   ;;  %v2615_v25 = vld [vmem:[%s3241_s11 + $0x98] sm:$0xff]  }
 0xb6e   : > { %1716 = vmatprep.subr.bf16.mxu1 %v2563_v28  ;;  %v2611_v21 = vld [vmem:[%s3241_s11 + $0x90] sm:$0xff]   ;;  %v2618_v28 = vld [vmem:[%s3241_s11 + $0x20] sm:$0xff]  }
 0xb6f   : > { %1433 = vadd.xlane.f32.xlu1 %v3006_v23 }
 0xb71   : > { %1717 = vmatpush1.bf16.msra.mxu1 %v2561_v30  ;;  %v2620_v30 = vld [vmem:[%s3241_s11 + $0x68] sm:$0xff]  }
 0xb72   : > { %1718 = vmatprep.subr.bf16.mxu1 %v2569_v31  ;;  %v2622_v31 = vld [vmem:[%s3241_s11 + $0x28] sm:$0xff]  }
 0xb75   : > { %1719 = vmatpush1.bf16.msra.mxu1 %v2567_v33  ;;  %v2624_v33 = vld [vmem:[%s3241_s11 + $0x70] sm:$0xff]  }
 0xb76   : > { %1720 = vmatprep.subr.bf16.mxu1 %v2575_v38  ;;  %v2630_v38 = vld [vmem:[%s3241_s11 + $0x38] sm:$0xff]  }
 0xb79   : > { %1721 = vmatpush1.bf16.msra.mxu1 %v2573_v40  ;;  %v1491_v40 = vld [vmem:[%s3240_s10] sm:$0xf] }
 0xb7a   : > { %1722 = vmatprep.subr.bf16.mxu1 %v2581_v42  ;;  %v1496_v42 = vrot.slane %v1491_v40, %v504_v47  ;;  %v1504_v45 = vrot.slane %v1491_v40, %v512_v44  ;;  %v1508_v49 = vrot.slane %v1491_v40, %v1507_v41 }
 0xb7d   : > { %1723 = vmatpush1.bf16.msra.mxu1 %v2579_v48  ;;  %v1500_v48 = vrot.slane %v1491_v40, %v508_v46 }
 0xb7e   : > { %1724 = vmatprep.subr.bf16.mxu1 %v2587_v50 }
 0xb81   : > { %1725 = vmatpush1.bf16.msra.mxu1 %v2585_v52 }
 0xb82   : > { %1726 = vmatprep.subr.bf16.mxu1 %v2593_v54 }
 0xb85   : > { %1727 = vmatpush1.bf16.msra.mxu1 %v2591_v56 }
 0xb86   : > { %1728 = vmatprep.subr.bf16.mxu1 %v2599_v58 }
 0xb89   : > { %1729 = vmatpush1.bf16.msra.mxu1 %v2597_v61 }
 0xb8a   : > { %2376 = vmatprep.subr.bf16.mxu1 %v2601_v4 }
 0xbfc   : > { %v1434_v34 = vpop.xlane.xlu1 %1433 }
 0xbfd   : > { %v1435_v35 = vmul.f32 0.0078125, %v1434_v34  ;;  %v2625_v34 = vld [vmem:[%s3241_s11 + $0xf0] sm:$0xff]  }
 0xbff   : > { %v1436_v36 = vsub.f32 %v3006_v23, %v1435_v35  ;;  %v2626_v35 = vld [vmem:[%s3241_s11 + $0x30] sm:$0xff]  }
 0xc01   : > { %v1437_v63 = vmul.f32 %v1436_v36, %v1436_v36 }
 0xc03   : > { %1438 = vadd.xlane.f32.xlu1 %v1437_v63  ;;  %v2628_v63 = vld [vmem:[%s3241_s11 + $0x78] sm:$0xff]  }
 0xc90   : > { %v1439_v8 = vpop.xlane.xlu1 %1438 }
 0xc91   : > { %v1440_v59 = vmul.f32 0.0078125, %v1439_v8 }
 0xc93   : > { %v1441_v62 = vadd.f32 1e-06, %v1440_v59 }
 0xc95   : > { %2650 = vrsqrt.f32 %v1441_v62 }
 0xc9f   : > { %v2651_v0 = vpop.eup %2650 }
 0xca0   : > { %v1443_v5 = vmul.f32 %v2651_v0, %v1436_v36  ;;  %v2627_v36 = vld [vmem:[%s3241_s11 + $0xb0] sm:$0xff]  }
 0xca2   : > { %v1450_v7 = vmul.f32 %v2248_v2, %v1443_v5 }
 0xca4   : > { %v1457_v9 = vadd.f32 %v2249_v6, %v1450_v7 }
 0xca6   : > { %v1458_v10 = vpack.c.bf16 %v1457_v9, %v1457_v9 }
 0xca8   : > { %1706 = vmatmul.mubr.bf16.vlgmr.msra.gmra.mrb[28].mxu0 %v1458_v10  ;;  %1747 = vmatmul.mubr.bf16.vlgmr.msra.gmra.mrb[28].mxu1 %v1458_v10 }
 0xca9   : > { %2355 = vmatpush3.bf16.msra.mxu0 %v2602_v13  ;;  %2377 = vmatpush3.bf16.msra.mxu1 %v2603_v12 }
 0xcaa   : > { %2356 = vmatprep.subr.bf16.mxu0 %v2604_v14  ;;  %2378 = vmatprep.subr.bf16.mxu1 %v2605_v15 }
 0xcad   : > { %2357 = vmatpush3.bf16.msra.mxu0 %v2606_v16  ;;  %2379 = vmatpush3.bf16.msra.mxu1 %v2607_v17 }
 0xcae   : > { %2358 = vmatprep.subr.bf16.mxu0 %v2608_v18  ;;  %2380 = vmatprep.subr.bf16.mxu1 %v2609_v19 }
 0xcb1   : > { %2359 = vmatpush3.bf16.msra.mxu0 %v2610_v20  ;;  %2381 = vmatpush3.bf16.msra.mxu1 %v2611_v21 }
 0xcb2   : > { %2360 = vmatprep.subr.bf16.mxu0 %v2612_v22  ;;  %2382 = vmatprep.subr.bf16.mxu1 %v2613_v24 }
 0xcb5   : > { %2361 = vmatpush3.bf16.msra.mxu0 %v2614_v26  ;;  %2383 = vmatpush3.bf16.msra.mxu1 %v2615_v25 }
 0xcb6   : > { %2362 = vmatprep.subr.bf16.mxu0 %v2616_v1  ;;  %2384 = vmatprep.subr.bf16.mxu1 %v2617_v27 }
 0xcb9   : > { %2363 = vmatpush3.bf16.msra.mxu0 %v2618_v28  ;;  %2385 = vmatpush3.bf16.msra.mxu1 %v2619_v29 }
 0xcba   : > { %2364 = vmatprep.subr.bf16.mxu0 %v2620_v30  ;;  %2386 = vmatprep.subr.bf16.mxu1 %v2621_v3 }
 0xcbd   : > { %2365 = vmatpush3.bf16.msra.mxu0 %v2622_v31  ;;  %2387 = vmatpush3.bf16.msra.mxu1 %v2623_v32 }
 0xcbe   : > { %2366 = vmatprep.subr.bf16.mxu0 %v2624_v33  ;;  %2388 = vmatprep.subr.bf16.mxu1 %v2625_v34 }
 0xcc1   : > { %2367 = vmatpush3.bf16.msra.mxu0 %v2626_v35  ;;  %2389 = vmatpush3.bf16.msra.mxu1 %v2627_v36 }
 0xcc2   : > { %2368 = vmatprep.subr.bf16.mxu0 %v2628_v63  ;;  %2390 = vmatprep.subr.bf16.mxu1 %v2629_v37  ;;  %v2282_v37 = vld [vmem:[%s3242_s12] ss:$0 sm:$0xff] }
 0xcc5   : > { %2369 = vmatpush3.bf16.msra.mxu0 %v2630_v38  ;;  %2391 = vmatpush3.bf16.msra.mxu1 %v2631_v39 }
 0xd7b   : > { %v1707_v50 = vpop.f32.mrb[28].mxu0  ;;  %v1748_v51 = vpop.f32.mrb[28].mxu1 }
 0xd7c   : > { %v1708_v52 = vadd.f32 %v1707_v50, %v1496_v42  ;;  %v1749_v53 = vadd.f32 %v1748_v51, %v1504_v45  ;;  %v1709_v54 = vpop.f32.mrb[29].mxu0  ;;  %v1750_v55 = vpop.f32.mrb[29].mxu1 }
 0xd7d   : > { %v1710_v56 = vadd.f32 %v1709_v54, %v1500_v48  ;;  %v1751_v57 = vadd.f32 %v1750_v55, %v1508_v49  ;;  %v1711_v58 = vpop.f32.mrb[30].mxu0  ;;  %v1752_v60 = vpop.f32.mrb[30].mxu1 }
 0xd7e   : > { %v1759_v61 = vmul.f32 0.044715, %v1708_v52  ;;  %v1761_v8 = vmul.f32 0.044715, %v1749_v53  ;;  %v1712_v47 = vpop.f32.mrb[31].mxu0  ;;  %v1753_v59 = vpop.f32.mrb[31].mxu1 }
 0xd7f   : > { %v1760_v62 = vmul.f32 0.044715, %v1710_v56  ;;  %v1762_v44 = vmul.f32 0.044715, %v1751_v57  ;;  %v1755_v19 = vmul.f32 0.5, %v1708_v52  ;;  %v1756_v22 = vmul.f32 0.5, %v1710_v56 }
 0xd80   : > { %v1763_v0 = vmul.f32 %v1759_v61, %v1708_v52  ;;  %v1765_v43 = vmul.f32 %v1761_v8, %v1749_v53  ;;  %v1758_v25 = vmul.f32 0.5, %v1751_v57  ;;  %v1757_v29 = vmul.f32 0.5, %v1749_v53 }
 0xd81   : > { %v1764_v46 = vmul.f32 %v1760_v62, %v1710_v56  ;;  %v1766_v2 = vmul.f32 %v1762_v44, %v1751_v57 }
 0xd82   : > { %v1767_v5 = vmul.f32 %v1763_v0, %v1708_v52  ;;  %v1769_v6 = vmul.f32 %v1765_v43, %v1749_v53 }
 0xd83   : > { %v1768_v7 = vmul.f32 %v1764_v46, %v1710_v56  ;;  %v1770_v9 = vmul.f32 %v1766_v2, %v1751_v57 }
 0xd84   : > { %v1771_v10 = vadd.f32 %v1767_v5, %v1708_v52  ;;  %v1773_v11 = vadd.f32 %v1769_v6, %v1749_v53 }
 0xd85   : > { %v1772_v4 = vadd.f32 %v1768_v7, %v1710_v56  ;;  %v1774_v13 = vadd.f32 %v1770_v9, %v1751_v57 }
 0xd86   : > { %v1775_v12 = vmul.f32 0.7978846, %v1771_v10  ;;  %v1777_v16 = vmul.f32 0.7978846, %v1773_v11 }
 0xd87   : > { %v1776_v14 = vmul.f32 0.7978846, %v1772_v4  ;;  %v1778_v15 = vmul.f32 0.7978846, %v1774_v13 }
 0xd88   : > { %2652 = vtanh.f32 %v1775_v12 }
 0xd89   : > { %2654 = vtanh.f32 %v1776_v14 }
 0xd8a   : > { %2656 = vtanh.f32 %v1778_v15 }
 0xd8b   : > { %2658 = vtanh.f32 %v1777_v16 }
 0xd92   : > { %v2653_v17 = vpop.eup %2652 }
 0xd93   : > { %v2655_v18 = vpop.eup %2654  ;;  %v1783_v20 = vadd.f32 1.0, %v2653_v17 }
 0xd94   : > { %v2657_v21 = vpop.eup %2656  ;;  %v1784_v24 = vadd.f32 1.0, %v2655_v18 }
 0xd95   : > { %v2659_v26 = vpop.eup %2658  ;;  %v1786_v1 = vadd.f32 1.0, %v2657_v21  ;;  %v1787_v27 = vmul.f32 %v1783_v20, %v1755_v19 }
 0xd96   : > { %v1788_v28 = vmul.f32 %v1784_v24, %v1756_v22  ;;  %v1785_v30 = vadd.f32 1.0, %v2659_v26 }
 0xd97   : > { %v1790_v3 = vmul.f32 %v1786_v1, %v1758_v25  ;;  %v1791_v34 = vpack.c.bf16 %v1787_v27, %v1787_v27 }
 0xd98   : > { %v1792_v31 = vpack.c.bf16 %v1788_v28, %v1788_v28  ;;  %v1789_v32 = vmul.f32 %v1785_v30, %v1757_v29 }
 0xd99   : > { %v1794_v33 = vpack.c.bf16 %v1790_v3, %v1790_v3 }
 0xd9a   : > { %2090 = vmatprep.mubr.bf16.mxu0 %v1792_v31  ;;  %v1793_v35 = vpack.c.bf16 %v1789_v32, %v1789_v32 }
 0xd9b   : > { %2130 = vmatprep.mubr.bf16.mxu1 %v1794_v33  ;;  %2091 = vmatmul.mubr.bf16.vlgmr.msra.gmra.mrb[32].mxu0 %v1791_v34 }
 0xd9c   : > { %2131 = vmatmul.mubr.bf16.vlgmr.msra.gmra.mrb[32].mxu1 %v1793_v35 }
 0xe6e   : > { %v2370_v36 = vpop.f32.mrb[32].mxu0 }
 0xe6f   : > { %v2392_v63 = vpop.f32.mrb[32].mxu1  ;;  %v2371_v38 = vpop.f32.mrb[33].mxu0 }
 0xe70   : > { %v2372_v39 = vadd.f32 %v2371_v38, %v2370_v36  ;;  %v2393_v40 = vpop.f32.mrb[33].mxu1  ;;  %v2373_v41 = vpop.f32.mrb[34].mxu0 }
 0xe71   : > { %v2394_v42 = vadd.f32 %v2393_v40, %v2392_v63  ;;  %v2395_v45 = vpop.f32.mrb[34].mxu1  ;;  %v2374_v48 = vpop.f32.mrb[35].mxu0 }
 0xe72   : > { %v2093_v49 = vadd.f32 %v2372_v39, %v2282_v37  ;;  %v2396_v50 = vpop.f32.mrb[35].mxu1 }
 0xe74   : > { %v2133_v51 = vadd.f32 %v2394_v42, %v2093_v49 }
 0xe76   : > { %v2138_v52 = vadd.f32 %v2133_v51, %v3006_v23 }
 0xe78   : > { %v2139_v53 = vpack.c.bf16 %v2138_v52, %v2138_v52 }
 0xe7a   : > { %2140 = vst [vmem:[%s435_s17] sm:$0xf] %v2139_v53 }
 0xe7b PF: > { %s23_s25 = sadd.s32 1, %s2666_s25  }
 0xe7c   : > { %p20_p4 = scmp.ge.s32.totalorder %s23_s25, 4  }
 0xe7e   :  { %22 = sbr.rel (!%p20_p4) target bundleno = 1 (0x1), region = 102 }

</bundles_post_ra>
